<compile_context>
chip_gen: v7x
topology: tpu7x:2x2x1
jax: 0.10.0
libtpu: 0.0.40
codegen_flags: <defaults>
</compile_context>

<pallas_src>
import jax
import jax.numpy as jnp
from jax.experimental import pallas as pl
from jax.experimental.pallas import tpu as pltpu

EPS = 1e-5
NUM_LAYERS = 4


def _fused_encoder_kernel(x_ref, w1_ref, wrest_ref, gamma_ref, beta_ref,
                          o_ref,
                          act_ref, mean_ref, m2_ref, scale_ref, shift_ref):
    """Fused 4x(1x1 conv -> BN(batch stats) -> ReLU), transposed layout.

      phase 0     : y1 = W1 @ x_tile              -> act; accumulate BN1 stats
      phase 1..3  : a  = relu(act*scale + shift)  (BN of layer p)
                    y  = W_{p+1} @ a              -> act; accumulate BN stats
      phase 4     : o  = relu(act*scale + shift)  (BN of layer 4) -> HBM
    """
    p = pl.program_id(0)
    n = pl.program_id(1)
    r = pl.program_id(2)
    num_r = pl.num_programs(2)
    t = n * num_r + r                         # flat tile index into act_ref

    num_tiles = act_ref.shape[0]
    tm = act_ref.shape[2]
    inv_m = 1.0 / float(num_tiles * tm)       # 1 / (N*H*W)

    is_first_tile = jnp.logical_and(n == 0, r == 0)
    is_last_tile = jnp.logical_and(n == pl.num_programs(1) - 1, r == num_r - 1)

    # ---- reset BN stat accumulators at the start of every phase ----
    @pl.when(is_first_tile)
    def _():
        mean_ref[...] = jnp.zeros_like(mean_ref)
        m2_ref[...] = jnp.zeros_like(m2_ref)

    def accumulate_stats(y):
        # Chan's parallel-variance combine: numerically safe single pass.
        tile_mean = jnp.mean(y, axis=1, keepdims=True)           # (F, 1)
        d = y - tile_mean
        tile_m2 = jnp.sum(d * d, axis=1, keepdims=True)          # (F, 1)
        n_a = (t * tm).astype(jnp.float32)                       # rows so far
        n_b = float(tm)
        n_ab = n_a + n_b
        delta = tile_mean - mean_ref[...]
        mean_ref[...] = mean_ref[...] + delta * (n_b / n_ab)
        m2_ref[...] = (m2_ref[...] + tile_m2
                       + (delta * delta) * (n_a * (n_b / n_ab)))

    # ---- phase 0: layer-1 matmul straight from the input tile ----
    @pl.when(p == 0)
    def _():
        x = x_ref[0].astype(jnp.float32)                          # (Cin, TM)
        y = jnp.dot(w1_ref[...], x, preferred_element_type=jnp.float32)
        act_ref[t] = y
        accumulate_stats(y)

    # ---- phases 1..3: previous BN+ReLU fused with the next matmul ----
    @pl.when(jnp.logical_and(p >= 1, p <= NUM_LAYERS - 1))
    def _():
        a = jnp.maximum(act_ref[t] * scale_ref[...] + shift_ref[...], 0.0)
        y = jnp.dot(wrest_ref[0], a, preferred_element_type=jnp.float32)
        act_ref[t] = y
        accumulate_stats(y)

    # ---- end of a stats phase: fold BN into one scale/shift pair ----
    @pl.when(jnp.logical_and(p <= NUM_LAYERS - 1, is_last_tile))
    def _():
        var = m2_ref[...] * inv_m                                 # biased var
        inv = jax.lax.rsqrt(var + EPS)
        g = gamma_ref[0]                                          # (F, 1)
        scale_ref[...] = g * inv
        shift_ref[...] = beta_ref[0] - g * inv * mean_ref[...]

    # ---- phase 4: final BN+ReLU, stream lane-dense output tiles to HBM ----
    @pl.when(p == NUM_LAYERS)
    def _():
        a = jnp.maximum(act_ref[t] * scale_ref[...] + shift_ref[...], 0.0)
        o_ref[0] = a.astype(o_ref.dtype)


def _pick_spatial_tile(hw):
    """Largest lane-friendly tile (multiple of 128, <= 2048) dividing H*W."""
    if hw % 128 != 0:
        # TODO(synk): pad the spatial axis to a multiple of 128 (with masked
        # BN statistics) instead of falling back to a lane-padded full tile.
        return hw
    tm = 128
    while tm * 2 <= min(hw, 2048) and hw % (tm * 2) == 0:
        tm *= 2
    return tm


def init_params(key, input_channels, feature_dim=64):
    """Deterministic synthetic parameters matching CNNEncoder's shapes."""
    params = []
    c_in = input_channels
    for _ in range(NUM_LAYERS):
        key, kw, kb = jax.random.split(key, 3)
        # Conv2d(c_in, feature_dim, 1): weight (Cout, Cin, 1, 1) -> (Cout, Cin)
        bound = 1.0 / float(c_in) ** 0.5
        w = jax.random.uniform(kw, (feature_dim, c_in), jnp.float32,
                               minval=-bound, maxval=bound)
        b = jax.random.uniform(kb, (feature_dim,), jnp.float32,
                               minval=-bound, maxval=bound)
        # BatchNorm2d affine params: PyTorch init weight=1, bias=0.
        gamma = jnp.ones((feature_dim,), jnp.float32)
        beta = jnp.zeros((feature_dim,), jnp.float32)
        params.append((w, b, gamma, beta))
        c_in = feature_dim
    return params


@jax.jit
def cnn_encoder_forward(x_nchw, params):
    """x_nchw: (N, C, H, W) float32 -> (N, feature_dim, H, W) float32."""
    N, C, H, W = x_nchw.shape
    hw = H * W
    feat = params[0][0].shape[0]

    tm = _pick_spatial_tile(hw)
    r_tiles = hw // tm
    num_tiles = N * r_tiles

    # Resident activation plane must fit comfortably in VMEM (v7x: 64 MiB/TC).
    act_bytes = num_tiles * feat * tm * 4
    if act_bytes > 40 * 1024 * 1024:
        # TODO(synk): tiled two-pass-BN multi-kernel fallback for very large
        # N*H*W where the activation plane cannot stay VMEM-resident.
        raise ValueError("activation plane too large to stay VMEM-resident")

    x3 = x_nchw.reshape(N, C, hw)                              # free reshape

    w1 = params[0][0]                                          # (F, Cin)
    w_rest = jnp.stack([params[i][0] for i in range(1, NUM_LAYERS)])  # (3,F,F)
    gammas = jnp.stack([p[2] for p in params]).reshape(NUM_LAYERS, feat, 1)
    betas = jnp.stack([p[3] for p in params]).reshape(NUM_LAYERS, feat, 1)
    # NOTE: conv biases params[i][1] are intentionally not passed — the
    # training-mode BN mean subtraction cancels them exactly.

    grid = (NUM_LAYERS + 1, N, r_tiles)

    def x_map(p, n, r):
        on = p == 0
        return (jnp.where(on, n, 0), 0, jnp.where(on, r, 0))

    def o_map(p, n, r):
        on = p == NUM_LAYERS
        return (jnp.where(on, n, 0), 0, jnp.where(on, r, 0))

    out3 = pl.pallas_call(
        _fused_encoder_kernel,
        out_shape=jax.ShapeDtypeStruct((N, feat, hw), x_nchw.dtype),
        grid_spec=pltpu.PrefetchScalarGridSpec(
            num_scalar_prefetch=0,
            grid=grid,
            in_specs=[
                pl.BlockSpec((1, C, tm), x_map),                       # x
                pl.BlockSpec((feat, C), lambda p, n, r: (0, 0)),       # W1
                pl.BlockSpec(
                    (1, feat, feat),
                    lambda p, n, r: (jnp.clip(p - 1, 0, NUM_LAYERS - 2), 0, 0)),
                pl.BlockSpec(
                    (1, feat, 1),
                    lambda p, n, r: (jnp.minimum(p, NUM_LAYERS - 1), 0, 0)),
                pl.BlockSpec(
                    (1, feat, 1),
                    lambda p, n, r: (jnp.minimum(p, NUM_LAYERS - 1), 0, 0)),
            ],
            out_specs=pl.BlockSpec((1, feat, tm), o_map),
            scratch_shapes=[
                pltpu.VMEM((num_tiles, feat, tm), jnp.float32),  # resident act
                pltpu.VMEM((feat, 1), jnp.float32),              # running mean
                pltpu.VMEM((feat, 1), jnp.float32),              # running M2
                pltpu.VMEM((feat, 1), jnp.float32),              # BN scale
                pltpu.VMEM((feat, 1), jnp.float32),              # BN shift
            ],
        ),
        compiler_params=pltpu.CompilerParams(
            # Every axis carries state (resident activations + BN stats), so
            # all are sequential.  TODO(synk): core_map over the 2-TC v7x mesh
            # with per-core partial stats + a shared-memory combine.
            dimension_semantics=("arbitrary", "arbitrary", "arbitrary"),
            vmem_limit_bytes=48 * 1024 * 1024,
        ),
    )(x3, w1, w_rest, gammas, betas)

    return out3.reshape(N, feat, H, W)                         # free reshape


def _reference_forward(x_nchw, params):
    """Pure-JAX reference of the PyTorch module (includes the conv bias)."""
    N, C, H, W = x_nchw.shape
    out = jnp.transpose(x_nchw, (0, 2, 3, 1)).reshape(N * H * W, C)
    for (w, b, gamma, beta) in params:
        y = out @ w.T + b
        mu = jnp.mean(y, axis=0, keepdims=True)
        var = jnp.mean((y - mu) ** 2, axis=0, keepdims=True)
        y = gamma * (y - mu) / jnp.sqrt(var + EPS) + beta
        out = jnp.maximum(y, 0.0)
    feat = out.shape[-1]
    return jnp.transpose(out.reshape(N, H, W, feat), (0, 3, 1, 2))


if __name__ == "__main__":
    key = jax.random.PRNGKey(0)
    k_x, k_p = jax.random.split(key)

    N, C_IN, H, W = 2, 4, 16, 16
    FEATURE_DIM = 64

    x = jax.random.normal(k_x, (N, C_IN, H, W), jnp.float32)
    params = init_params(k_p, C_IN, FEATURE_DIM)

    out = cnn_encoder_forward(x, params)
    out = jax.block_until_ready(out)

    ref = _reference_forward(x, params)
    assert out.shape == (N, FEATURE_DIM, H, W), out.shape
    max_err = float(jnp.max(jnp.abs(out - ref)))
    assert max_err < 2e-4, max_err

    print("KERNEL_OK")
</pallas_src>

<mosaic_0001>
module attributes {stable_mosaic.version = 11 : i64} {
  func.func @_fused_encoder_kernel(%arg0: i32, %arg1: i32, %arg2: i32, %arg3: memref<1x4x256xf32, #tpu.memory_space<vmem>>, %arg4: memref<64x4xf32, #tpu.memory_space<vmem>>, %arg5: memref<1x64x64xf32, #tpu.memory_space<vmem>>, %arg6: memref<1x64x1xf32, #tpu.memory_space<vmem>>, %arg7: memref<1x64x1xf32, #tpu.memory_space<vmem>>, %arg8: memref<1x64x256xf32, #tpu.memory_space<vmem>>, %arg9: memref<2x64x256xf32, #tpu.memory_space<vmem>>, %arg10: memref<64x1xf32, #tpu.memory_space<vmem>>, %arg11: memref<64x1xf32, #tpu.memory_space<vmem>>, %arg12: memref<64x1xf32, #tpu.memory_space<vmem>>, %arg13: memref<64x1xf32, #tpu.memory_space<vmem>>) attributes {dimension_semantics = [#tpu.dimension_semantics<arbitrary>, #tpu.dimension_semantics<arbitrary>, #tpu.dimension_semantics<arbitrary>], iteration_bounds = array<i64: 5, 2, 1>, scalar_prefetch = 0 : i64, scratch_operands = 5 : i64, tpu.core_type = #tpu.core_type<tc>, window_params = [{transform_indices = @transform_0, window_bounds = array<i64: 1, 4, 256>}, {pipeline_mode = #tpu.pipeline_mode<synchronous>, transform_indices = @transform_1, window_bounds = array<i64: 64, 4>}, {transform_indices = @transform_2, window_bounds = array<i64: 1, 64, 64>}, {transform_indices = @transform_3, window_bounds = array<i64: 1, 64, 1>}, {transform_indices = @transform_4, window_bounds = array<i64: 1, 64, 1>}, {transform_indices = @transform_5, window_bounds = array<i64: 1, 64, 256>}]} {
    %c1_i32 = arith.constant 1 : i32
    %0 = arith.muli %arg1, %c1_i32 : i32
    %1 = arith.addi %0, %arg2 : i32
    %c0_i32 = arith.constant 0 : i32
    %2 = arith.cmpi eq, %arg1, %c0_i32 : i32
    %c0_i32_0 = arith.constant 0 : i32
    %3 = arith.cmpi eq, %arg2, %c0_i32_0 : i32
    %4 = arith.andi %2, %3 : i1
    %c1_i32_1 = arith.constant 1 : i32
    %5 = arith.cmpi eq, %arg1, %c1_i32_1 : i32
    %c0_i32_2 = arith.constant 0 : i32
    %6 = arith.cmpi eq, %arg2, %c0_i32_2 : i32
    %7 = arith.andi %5, %6 : i1
    %8 = arith.extui %4 : i1 to i32
    %c0_i32_3 = arith.constant 0 : i32
    %9 = arith.cmpi ne, %8, %c0_i32_3 : i32
    scf.if %9 {
      %cst = arith.constant 0.000000e+00 : f32
      %25 = vector.broadcast %cst : f32 to vector<64x1xf32>
      %c0 = arith.constant 0 : index
      %c0_11 = arith.constant 0 : index
      %26 = vector.load %arg10[%c0, %c0_11] : memref<64x1xf32, #tpu.memory_space<vmem>>, vector<64x1xf32>
      tpu.vector_store %arg10[%c0, %c0_11], %25 {strides = array<i32>} : memref<64x1xf32, #tpu.memory_space<vmem>>, vector<64x1xf32>,
      %cst_12 = arith.constant 0.000000e+00 : f32
      %27 = vector.broadcast %cst_12 : f32 to vector<64x1xf32>
      %c0_13 = arith.constant 0 : index
      %c0_14 = arith.constant 0 : index
      %28 = vector.load %arg11[%c0_13, %c0_14] : memref<64x1xf32, #tpu.memory_space<vmem>>, vector<64x1xf32>
      tpu.vector_store %arg11[%c0_13, %c0_14], %27 {strides = array<i32>} : memref<64x1xf32, #tpu.memory_space<vmem>>, vector<64x1xf32>,
    } else {
    }
    %c0_i32_4 = arith.constant 0 : i32
    %10 = arith.cmpi eq, %arg0, %c0_i32_4 : i32
    %11 = arith.extui %10 : i1 to i32
    %c0_i32_5 = arith.constant 0 : i32
    %12 = arith.cmpi ne, %11, %c0_i32_5 : i32
    scf.if %12 {
      %c0 = arith.constant 0 : index
      %c0_11 = arith.constant 0 : index
      %c0_12 = arith.constant 0 : index
      %25 = vector.load %arg3[%c0, %c0_11, %c0_12] : memref<1x4x256xf32, #tpu.memory_space<vmem>>, vector<1x4x256xf32>
      %26 = vector.shape_cast %25 : vector<1x4x256xf32> to vector<4x256xf32>
      %c0_13 = arith.constant 0 : index
      %c0_14 = arith.constant 0 : index
      %27 = vector.load %arg4[%c0_13, %c0_14] : memref<64x4xf32, #tpu.memory_space<vmem>>, vector<64x4xf32>
      %cst = arith.constant dense<0.000000e+00> : vector<64x256xf32>
      %28 = tpu.matmul %27, %26, %cst {dimension_numbers = #tpu.dot_dimension_numbers<[1], [0], [0], [1], [0, 0, 1, 1], [], []>} : vector<64x4xf32>, vector<4x256xf32>, vector<64x256xf32> -> vector<64x256xf32>
      %29 = arith.index_cast %1 : i32 to index
      %c0_15 = arith.constant 0 : index
      %c0_16 = arith.constant 0 : index
      %30 = vector.load %arg9[%29, %c0_15, %c0_16] : memref<2x64x256xf32, #tpu.memory_space<vmem>>, vector<1x64x256xf32>
      %31 = vector.shape_cast %30 : vector<1x64x256xf32> to vector<64x256xf32>
      %32 = vector.shape_cast %28 : vector<64x256xf32> to vector<1x64x256xf32>
      tpu.vector_store %arg9[%29, %c0_15, %c0_16], %32 {strides = array<i32>} : memref<2x64x256xf32, #tpu.memory_space<vmem>>, vector<1x64x256xf32>,
      %cst_17 = arith.constant dense<0.000000e+00> : vector<64xf32>
      %33 = vector.multi_reduction <add>, %28, %cst_17 [1] : vector<64x256xf32> to vector<64xf32>
      %34 = vector.shape_cast %33 : vector<64xf32> to vector<64x1xf32>
      %cst_18 = arith.constant 2.560000e+02 : f32
      %35 = vector.broadcast %cst_18 : f32 to vector<64x1xf32>
      %36 = arith.divf %34, %35 : vector<64x1xf32>
      %37 = vector.broadcast %36 : vector<64x1xf32> to vector<64x256xf32>
      %38 = arith.subf %28, %37 : vector<64x256xf32>
      %39 = arith.mulf %38, %38 : vector<64x256xf32>
      %cst_19 = arith.constant dense<0.000000e+00> : vector<64xf32>
      %40 = vector.multi_reduction <add>, %39, %cst_19 [1] : vector<64x256xf32> to vector<64xf32>
      %41 = vector.shape_cast %40 : vector<64xf32> to vector<64x1xf32>
      %c256_i32 = arith.constant 256 : i32
      %42 = arith.muli %1, %c256_i32 : i32
      %43 = arith.sitofp %42 : i32 to f32
      %cst_20 = arith.constant 2.560000e+02 : f32
      %44 = arith.addf %43, %cst_20 : f32
      %c0_21 = arith.constant 0 : index
      %c0_22 = arith.constant 0 : index
      %45 = vector.load %arg10[%c0_21, %c0_22] : memref<64x1xf32, #tpu.memory_space<vmem>>, vector<64x1xf32>
      %46 = arith.subf %36, %45 : vector<64x1xf32>
      %c0_23 = arith.constant 0 : index
      %c0_24 = arith.constant 0 : index
      %47 = vector.load %arg10[%c0_23, %c0_24] : memref<64x1xf32, #tpu.memory_space<vmem>>, vector<64x1xf32>
      %cst_25 = arith.constant 2.560000e+02 : f32
      %48 = arith.divf %cst_25, %44 : f32
      %49 = vector.broadcast %48 : f32 to vector<64x1xf32>
      %50 = arith.mulf %46, %49 : vector<64x1xf32>
      %51 = arith.addf %47, %50 : vector<64x1xf32>
      %c0_26 = arith.constant 0 : index
      %c0_27 = arith.constant 0 : index
      %52 = vector.load %arg10[%c0_26, %c0_27] : memref<64x1xf32, #tpu.memory_space<vmem>>, vector<64x1xf32>
      tpu.vector_store %arg10[%c0_26, %c0_27], %51 {strides = array<i32>} : memref<64x1xf32, #tpu.memory_space<vmem>>, vector<64x1xf32>,
      %c0_28 = arith.constant 0 : index
      %c0_29 = arith.constant 0 : index
      %53 = vector.load %arg11[%c0_28, %c0_29] : memref<64x1xf32, #tpu.memory_space<vmem>>, vector<64x1xf32>
      %54 = arith.addf %53, %41 : vector<64x1xf32>
      %55 = arith.mulf %46, %46 : vector<64x1xf32>
      %cst_30 = arith.constant 2.560000e+02 : f32
      %56 = arith.divf %cst_30, %44 : f32
      %57 = arith.mulf %43, %56 : f32
      %58 = vector.broadcast %57 : f32 to vector<64x1xf32>
      %59 = arith.mulf %55, %58 : vector<64x1xf32>
      %60 = arith.addf %54, %59 : vector<64x1xf32>
      %c0_31 = arith.constant 0 : index
      %c0_32 = arith.constant 0 : index
      %61 = vector.load %arg11[%c0_31, %c0_32] : memref<64x1xf32, #tpu.memory_space<vmem>>, vector<64x1xf32>
      tpu.vector_store %arg11[%c0_31, %c0_32], %60 {strides = array<i32>} : memref<64x1xf32, #tpu.memory_space<vmem>>, vector<64x1xf32>,
    } else {
    }
    %c1_i32_6 = arith.constant 1 : i32
    %13 = arith.cmpi sge, %arg0, %c1_i32_6 : i32
    %c3_i32 = arith.constant 3 : i32
    %14 = arith.cmpi sle, %arg0, %c3_i32 : i32
    %15 = arith.andi %13, %14 : i1
    %16 = arith.extui %15 : i1 to i32
    %c0_i32_7 = arith.constant 0 : i32
    %17 = arith.cmpi ne, %16, %c0_i32_7 : i32
    scf.if %17 {
      %25 = arith.index_cast %1 : i32 to index
      %c0 = arith.constant 0 : index
      %c0_11 = arith.constant 0 : index
      %26 = vector.load %arg9[%25, %c0, %c0_11] : memref<2x64x256xf32, #tpu.memory_space<vmem>>, vector<1x64x256xf32>
      %27 = vector.shape_cast %26 : vector<1x64x256xf32> to vector<64x256xf32>
      %c0_12 = arith.constant 0 : index
      %c0_13 = arith.constant 0 : index
      %28 = vector.load %arg12[%c0_12, %c0_13] : memref<64x1xf32, #tpu.memory_space<vmem>>, vector<64x1xf32>
      %29 = vector.broadcast %28 : vector<64x1xf32> to vector<64x256xf32>
      %30 = arith.mulf %27, %29 : vector<64x256xf32>
      %c0_14 = arith.constant 0 : index
      %c0_15 = arith.constant 0 : index
      %31 = vector.load %arg13[%c0_14, %c0_15] : memref<64x1xf32, #tpu.memory_space<vmem>>, vector<64x1xf32>
      %32 = vector.broadcast %31 : vector<64x1xf32> to vector<64x256xf32>
      %33 = arith.addf %30, %32 : vector<64x256xf32>
      %cst = arith.constant 0.000000e+00 : f32
      %34 = vector.broadcast %cst : f32 to vector<64x256xf32>
      %35 = arith.maximumf %33, %34 : vector<64x256xf32>
      %c0_16 = arith.constant 0 : index
      %c0_17 = arith.constant 0 : index
      %c0_18 = arith.constant 0 : index
      %36 = vector.load %arg5[%c0_16, %c0_17, %c0_18] : memref<1x64x64xf32, #tpu.memory_space<vmem>>, vector<1x64x64xf32>
      %37 = vector.shape_cast %36 : vector<1x64x64xf32> to vector<64x64xf32>
      %cst_19 = arith.constant dense<0.000000e+00> : vector<64x256xf32>
      %38 = tpu.matmul %37, %35, %cst_19 {dimension_numbers = #tpu.dot_dimension_numbers<[1], [0], [0], [1], [0, 0, 1, 1], [], []>} : vector<64x64xf32>, vector<64x256xf32>, vector<64x256xf32> -> vector<64x256xf32>
      %39 = arith.index_cast %1 : i32 to index
      %c0_20 = arith.constant 0 : index
      %c0_21 = arith.constant 0 : index
      %40 = vector.load %arg9[%39, %c0_20, %c0_21] : memref<2x64x256xf32, #tpu.memory_space<vmem>>, vector<1x64x256xf32>
      %41 = vector.shape_cast %40 : vector<1x64x256xf32> to vector<64x256xf32>
      %42 = vector.shape_cast %38 : vector<64x256xf32> to vector<1x64x256xf32>
      tpu.vector_store %arg9[%39, %c0_20, %c0_21], %42 {strides = array<i32>} : memref<2x64x256xf32, #tpu.memory_space<vmem>>, vector<1x64x256xf32>,
      %cst_22 = arith.constant dense<0.000000e+00> : vector<64xf32>
      %43 = vector.multi_reduction <add>, %38, %cst_22 [1] : vector<64x256xf32> to vector<64xf32>
      %44 = vector.shape_cast %43 : vector<64xf32> to vector<64x1xf32>
      %cst_23 = arith.constant 2.560000e+02 : f32
      %45 = vector.broadcast %cst_23 : f32 to vector<64x1xf32>
      %46 = arith.divf %44, %45 : vector<64x1xf32>
      %47 = vector.broadcast %46 : vector<64x1xf32> to vector<64x256xf32>
      %48 = arith.subf %38, %47 : vector<64x256xf32>
      %49 = arith.mulf %48, %48 : vector<64x256xf32>
      %cst_24 = arith.constant dense<0.000000e+00> : vector<64xf32>
      %50 = vector.multi_reduction <add>, %49, %cst_24 [1] : vector<64x256xf32> to vector<64xf32>
      %51 = vector.shape_cast %50 : vector<64xf32> to vector<64x1xf32>
      %c256_i32 = arith.constant 256 : i32
      %52 = arith.muli %1, %c256_i32 : i32
      %53 = arith.sitofp %52 : i32 to f32
      %cst_25 = arith.constant 2.560000e+02 : f32
      %54 = arith.addf %53, %cst_25 : f32
      %c0_26 = arith.constant 0 : index
      %c0_27 = arith.constant 0 : index
      %55 = vector.load %arg10[%c0_26, %c0_27] : memref<64x1xf32, #tpu.memory_space<vmem>>, vector<64x1xf32>
      %56 = arith.subf %46, %55 : vector<64x1xf32>
      %c0_28 = arith.constant 0 : index
      %c0_29 = arith.constant 0 : index
      %57 = vector.load %arg10[%c0_28, %c0_29] : memref<64x1xf32, #tpu.memory_space<vmem>>, vector<64x1xf32>
      %cst_30 = arith.constant 2.560000e+02 : f32
      %58 = arith.divf %cst_30, %54 : f32
      %59 = vector.broadcast %58 : f32 to vector<64x1xf32>
      %60 = arith.mulf %56, %59 : vector<64x1xf32>
      %61 = arith.addf %57, %60 : vector<64x1xf32>
      %c0_31 = arith.constant 0 : index
      %c0_32 = arith.constant 0 : index
      %62 = vector.load %arg10[%c0_31, %c0_32] : memref<64x1xf32, #tpu.memory_space<vmem>>, vector<64x1xf32>
      tpu.vector_store %arg10[%c0_31, %c0_32], %61 {strides = array<i32>} : memref<64x1xf32, #tpu.memory_space<vmem>>, vector<64x1xf32>,
      %c0_33 = arith.constant 0 : index
      %c0_34 = arith.constant 0 : index
      %63 = vector.load %arg11[%c0_33, %c0_34] : memref<64x1xf32, #tpu.memory_space<vmem>>, vector<64x1xf32>
      %64 = arith.addf %63, %51 : vector<64x1xf32>
      %65 = arith.mulf %56, %56 : vector<64x1xf32>
      %cst_35 = arith.constant 2.560000e+02 : f32
      %66 = arith.divf %cst_35, %54 : f32
      %67 = arith.mulf %53, %66 : f32
      %68 = vector.broadcast %67 : f32 to vector<64x1xf32>
      %69 = arith.mulf %65, %68 : vector<64x1xf32>
      %70 = arith.addf %64, %69 : vector<64x1xf32>
      %c0_36 = arith.constant 0 : index
      %c0_37 = arith.constant 0 : index
      %71 = vector.load %arg11[%c0_36, %c0_37] : memref<64x1xf32, #tpu.memory_space<vmem>>, vector<64x1xf32>
      tpu.vector_store %arg11[%c0_36, %c0_37], %70 {strides = array<i32>} : memref<64x1xf32, #tpu.memory_space<vmem>>, vector<64x1xf32>,
    } else {
    }
    %c3_i32_8 = arith.constant 3 : i32
    %18 = arith.cmpi sle, %arg0, %c3_i32_8 : i32
    %19 = arith.andi %18, %7 : i1
    %20 = arith.extui %19 : i1 to i32
    %c0_i32_9 = arith.constant 0 : i32
    %21 = arith.cmpi ne, %20, %c0_i32_9 : i32
    scf.if %21 {
      %c0 = arith.constant 0 : index
      %c0_11 = arith.constant 0 : index
      %25 = vector.load %arg11[%c0, %c0_11] : memref<64x1xf32, #tpu.memory_space<vmem>>, vector<64x1xf32>
      %cst = arith.constant 0.001953125 : f32
      %26 = vector.broadcast %cst : f32 to vector<64x1xf32>
      %27 = arith.mulf %25, %26 : vector<64x1xf32>
      %cst_12 = arith.constant 9.99999974E-6 : f32
      %28 = vector.broadcast %cst_12 : f32 to vector<64x1xf32>
      %29 = arith.addf %27, %28 : vector<64x1xf32>
      %30 = math.rsqrt %29 : vector<64x1xf32>
      %c0_13 = arith.constant 0 : index
      %c0_14 = arith.constant 0 : index
      %c0_15 = arith.constant 0 : index
      %31 = vector.load %arg6[%c0_13, %c0_14, %c0_15] : memref<1x64x1xf32, #tpu.memory_space<vmem>>, vector<1x64x1xf32>
      %32 = vector.shape_cast %31 : vector<1x64x1xf32> to vector<64x1xf32>
      %33 = arith.mulf %32, %30 : vector<64x1xf32>
      %c0_16 = arith.constant 0 : index
      %c0_17 = arith.constant 0 : index
      %34 = vector.load %arg12[%c0_16, %c0_17] : memref<64x1xf32, #tpu.memory_space<vmem>>, vector<64x1xf32>
      tpu.vector_store %arg12[%c0_16, %c0_17], %33 {strides = array<i32>} : memref<64x1xf32, #tpu.memory_space<vmem>>, vector<64x1xf32>,
      %c0_18 = arith.constant 0 : index
      %c0_19 = arith.constant 0 : index
      %c0_20 = arith.constant 0 : index
      %35 = vector.load %arg7[%c0_18, %c0_19, %c0_20] : memref<1x64x1xf32, #tpu.memory_space<vmem>>, vector<1x64x1xf32>
      %36 = vector.shape_cast %35 : vector<1x64x1xf32> to vector<64x1xf32>
      %37 = arith.mulf %32, %30 : vector<64x1xf32>
      %c0_21 = arith.constant 0 : index
      %c0_22 = arith.constant 0 : index
      %38 = vector.load %arg10[%c0_21, %c0_22] : memref<64x1xf32, #tpu.memory_space<vmem>>, vector<64x1xf32>
      %39 = arith.mulf %37, %38 : vector<64x1xf32>
      %40 = arith.subf %36, %39 : vector<64x1xf32>
      %c0_23 = arith.constant 0 : index
      %c0_24 = arith.constant 0 : index
      %41 = vector.load %arg13[%c0_23, %c0_24] : memref<64x1xf32, #tpu.memory_space<vmem>>, vector<64x1xf32>
      tpu.vector_store %arg13[%c0_23, %c0_24], %40 {strides = array<i32>} : memref<64x1xf32, #tpu.memory_space<vmem>>, vector<64x1xf32>,
    } else {
    }
    %c4_i32 = arith.constant 4 : i32
    %22 = arith.cmpi eq, %arg0, %c4_i32 : i32
    %23 = arith.extui %22 : i1 to i32
    %c0_i32_10 = arith.constant 0 : i32
    %24 = arith.cmpi ne, %23, %c0_i32_10 : i32
    scf.if %24 {
      %25 = arith.index_cast %1 : i32 to index
      %c0 = arith.constant 0 : index
      %c0_11 = arith.constant 0 : index
      %26 = vector.load %arg9[%25, %c0, %c0_11] : memref<2x64x256xf32, #tpu.memory_space<vmem>>, vector<1x64x256xf32>
      %27 = vector.shape_cast %26 : vector<1x64x256xf32> to vector<64x256xf32>
      %c0_12 = arith.constant 0 : index
      %c0_13 = arith.constant 0 : index
      %28 = vector.load %arg12[%c0_12, %c0_13] : memref<64x1xf32, #tpu.memory_space<vmem>>, vector<64x1xf32>
      %29 = vector.broadcast %28 : vector<64x1xf32> to vector<64x256xf32>
      %30 = arith.mulf %27, %29 : vector<64x256xf32>
      %c0_14 = arith.constant 0 : index
      %c0_15 = arith.constant 0 : index
      %31 = vector.load %arg13[%c0_14, %c0_15] : memref<64x1xf32, #tpu.memory_space<vmem>>, vector<64x1xf32>
      %32 = vector.broadcast %31 : vector<64x1xf32> to vector<64x256xf32>
      %33 = arith.addf %30, %32 : vector<64x256xf32>
      %cst = arith.constant 0.000000e+00 : f32
      %34 = vector.broadcast %cst : f32 to vector<64x256xf32>
      %35 = arith.maximumf %33, %34 : vector<64x256xf32>
      %c0_16 = arith.constant 0 : index
      %c0_17 = arith.constant 0 : index
      %c0_18 = arith.constant 0 : index
      %36 = vector.load %arg8[%c0_16, %c0_17, %c0_18] : memref<1x64x256xf32, #tpu.memory_space<vmem>>, vector<1x64x256xf32>
      %37 = vector.shape_cast %36 : vector<1x64x256xf32> to vector<64x256xf32>
      %38 = vector.shape_cast %35 : vector<64x256xf32> to vector<1x64x256xf32>
      tpu.vector_store %arg8[%c0_16, %c0_17, %c0_18], %38 {strides = array<i32>} : memref<1x64x256xf32, #tpu.memory_space<vmem>>, vector<1x64x256xf32>,
    } else {
    }
    return
  }
  func.func @transform_0(%arg0: i32, %arg1: i32, %arg2: i32) -> (i32, i32, i32) {
    %c0_i32 = arith.constant 0 : i32
    %0 = arith.cmpi eq, %arg0, %c0_i32 : i32
    %c0_i32_0 = arith.constant 0 : i32
    %1 = arith.select %0, %arg1, %c0_i32_0 : i32
    %c0_i32_1 = arith.constant 0 : i32
    %2 = arith.select %0, %arg2, %c0_i32_1 : i32
    %c0_i32_2 = arith.constant 0 : i32
    %c0_i32_3 = arith.constant 0 : i32
    return %1, %c0_i32_2, %2 : i32, i32, i32
  }
  func.func @transform_1(%arg0: i32, %arg1: i32, %arg2: i32) -> (i32, i32) {
    %c0_i32 = arith.constant 0 : i32
    %c0_i32_0 = arith.constant 0 : i32
    %c0_i32_1 = arith.constant 0 : i32
    return %c0_i32, %c0_i32_0 : i32, i32
  }
  func.func @transform_2(%arg0: i32, %arg1: i32, %arg2: i32) -> (i32, i32, i32) {
    %c1_i32 = arith.constant 1 : i32
    %0 = arith.subi %arg0, %c1_i32 : i32
    %c0_i32 = arith.constant 0 : i32
    %c2_i32 = arith.constant 2 : i32
    %1 = arith.maxsi %c0_i32, %0 : i32
    %2 = arith.minsi %c2_i32, %1 : i32
    %c0_i32_0 = arith.constant 0 : i32
    %c0_i32_1 = arith.constant 0 : i32
    %c0_i32_2 = arith.constant 0 : i32
    return %2, %c0_i32_0, %c0_i32_1 : i32, i32, i32
  }
  func.func @transform_3(%arg0: i32, %arg1: i32, %arg2: i32) -> (i32, i32, i32) {
    %c3_i32 = arith.constant 3 : i32
    %0 = arith.minsi %arg0, %c3_i32 : i32
    %c0_i32 = arith.constant 0 : i32
    %c0_i32_0 = arith.constant 0 : i32
    %c0_i32_1 = arith.constant 0 : i32
    return %0, %c0_i32, %c0_i32_0 : i32, i32, i32
  }
  func.func @transform_4(%arg0: i32, %arg1: i32, %arg2: i32) -> (i32, i32, i32) {
    %c3_i32 = arith.constant 3 : i32
    %0 = arith.minsi %arg0, %c3_i32 : i32
    %c0_i32 = arith.constant 0 : i32
    %c0_i32_0 = arith.constant 0 : i32
    %c0_i32_1 = arith.constant 0 : i32
    return %0, %c0_i32, %c0_i32_0 : i32, i32, i32
  }
  func.func @transform_5(%arg0: i32, %arg1: i32, %arg2: i32) -> (i32, i32, i32) {
    %c4_i32 = arith.constant 4 : i32
    %0 = arith.cmpi eq, %arg0, %c4_i32 : i32
    %c0_i32 = arith.constant 0 : i32
    %1 = arith.select %0, %arg1, %c0_i32 : i32
    %c0_i32_0 = arith.constant 0 : i32
    %2 = arith.select %0, %arg2, %c0_i32_0 : i32
    %c0_i32_1 = arith.constant 0 : i32
    %c0_i32_2 = arith.constant 0 : i32
    return %1, %c0_i32_1, %2 : i32, i32, i32
  }
}

</mosaic_0001>

<bundles_post_ra>
// kernel: cnn_encoder_forward.1
= control target key start
LH: loop header
LB: loop body
LE: loop exit
PB: predicated region body
PF: predicated region fallthrough
CT: control target
= control target key end

     0   :  { %s2034_s18 = smov 0   ;;  %s2036_s19 = smov 0   ;;  %s2570_s0 = inlined_call_operand.vmem [shape: f32[2,4,256], index: 0, kind: input, shape index: {}]   ;;  %s2571_s1 = inlined_call_operand.vmem [shape: f32[64,4], index: 1, kind: input, shape index: {}]   ;;  %s2572_s2 = inlined_call_operand.vmem [shape: f32[3,64,64], index: 2, kind: input, shape index: {}]   ;;  %s2573_s3 = inlined_call_operand.vmem [shape: f32[4,64,1], index: 3, kind: input, shape index: {}]   ;;  %s2574_s4 = inlined_call_operand.vmem [shape: f32[4,64,1], index: 4, kind: input, shape index: {}]   ;;  %s2575_s5 = inlined_call_operand.vmem [shape: f32[2,64,256], index: 5, kind: output, shape index: {}]  }
   0x1   :  { %s2038_s20 = smov 0   ;;  %s2040_s21 = smov 0  }
   0x2   :  { %s2042_s22 = smov 0  }
   0x3 LB: > { %s30_s23 = sadd.s32 1, %s1989_s20  ;;  %s34_s24 = sadd.s32 1, %s1993_s21  ;;  %s1997_s22 = sphi %s2042_s22, %s15_s22   ;;  %s1993_s21 = sphi %s2040_s21, %s2579_s21   ;;  %s1989_s20 = sphi %s2038_s20, %s2578_s20   ;;  %s1985_s19 = sphi %s2036_s19, %s2577_s19   ;;  %s1981_s18 = sphi %s2034_s18, %s2576_s18  }
   0x4   : > { %p32_p0 = scmp.ge.s32.totalorder %s30_s23, 2  ;;  %p1788_p1 = scmp.ge.s32.totalorder %s1997_s22, 1 }
   0x5   : > { %p299_p2 = scmp.lt.s32.totalorder %s1997_s22, 11 }
   0x6   : > { %s2581_s23 = smov (%p32_p0, %s30_s23), 0  ;;  %s2583_s24 = smov (!%p32_p0, %s34_s24), %s1993_s21 }
   0x7   : > { %p300_p3 = pnand %p1788_p1, %p299_p2  ;;  %p36_p4 = scmp.ge.s32.totalorder %s2583_s24, 5 }
   0x8   : > { %p365_p5 = scmp.eq.s32.totalorder (!%p300_p3), %s1985_s19, 0  ;;  %s1791_s25 = sadd.s32 (!%p300_p3), 4294967295, %s1985_s19 }
   0x9   : > { %s2585_s24 = smov (%p36_p4, %s2583_s24), 0  ;;  %303 = sbr.rel (%p300_p3) target bundleno = 1472 (0x5c0), region = 40 }
   0xa   : > { %p382_p6 = scmp.gt.s32.totalorder (!%p300_p3), %s1791_s25, 0  ;;  %p1792_p7 = scmp.lt.s32.totalorder (!%p300_p3), %s1791_s25, 2 }
   0xb   : > { %p396_p9 = scmp.lt.s32.totalorder (!%p300_p3), %s1985_s19, 3  ;;  %p414_p11 = scmp.eq.s32.totalorder (!%p300_p3), %s1985_s19, 4 }
   0xc   : > { %p431_p12 = scmp.eq.s32.totalorder (!%p300_p3), %s1981_s18, 0  ;;  %p435_p13 = scmp.eq.s32.totalorder (!%p300_p3), %s1981_s18, 1 }
  0x10   : > { %s366_s26 = scalar_select %p365_p5, %s1981_s18, 0 }
  0x11   : > { %s2587_s25 = smov (!%p382_p6, %s1791_s25), 0  ;;  %vm440_vm0 = vcmask (%p431_p12), 7168   ;;  %v1999_v0 = vmov (%p431_p12), 0.0  }
  0x12   : > { %p369_p8 = scmp.lt.s32.totalorder %s366_s26, 1  ;;  %s2589_s25 = smov (!%p1792_p7, %s2587_s25), 2  ;;  %441 = vst.msk [vmem:[#allocation3] sm:$0xff] (%p431_p12), %vm440_vm0, %v1999_v0  ;;  %442 = vst.msk [vmem:[#allocation3 + $0x8] sm:$0xff] (%p431_p12), %vm440_vm0, %v1999_v0 }
  0x13   : > { %p386_p10 = scmp.lt.s32.totalorder %s2589_s25, 2  ;;  %443 = vst.msk [vmem:[#allocation3 + $0x10] sm:$0xff] (%p431_p12), %vm440_vm0, %v1999_v0  ;;  %444 = vst.msk [vmem:[#allocation3 + $0x18] sm:$0xff] (%p431_p12), %vm440_vm0, %v1999_v0 }
  0x14   : > { %s2591_s26 = smov (!%p369_p8, %s366_s26), 1  ;;  %445 = vst.msk [vmem:[#allocation3 + $0x20] sm:$0xff] (%p431_p12), %vm440_vm0, %v1999_v0  ;;  %446 = vst.msk [vmem:[#allocation3 + $0x28] sm:$0xff] (%p431_p12), %vm440_vm0, %v1999_v0 }
  0x15   : > { %s1847_s27 = sshll.u32 %s2591_s26, 3  ;;  %s2593_s25 = smov (!%p386_p10, %s2589_s25), 2  ;;  %447 = vst.msk [vmem:[#allocation3 + $0x30] sm:$0xff] (%p431_p12), %vm440_vm0, %v1999_v0  ;;  %448 = vst.msk [vmem:[#allocation3 + $0x38] sm:$0xff] (%p431_p12), %vm440_vm0, %v1999_v0 }
  0x16   : > { %s2077_s30 = scalar_lea.vmem %s2570_s0, %s1847_s27  ;;  %s1850_s7 = sshll.u32 %s2593_s25, 6  ;;  %449 = vst.msk [vmem:[#allocation4] sm:$0xff] (%p431_p12), %vm440_vm0, %v1999_v0  ;;  %450 = vst.msk [vmem:[#allocation4 + $0x8] sm:$0xff] (%p431_p12), %vm440_vm0, %v1999_v0 }
  0x17   : > { %s397_s6 = scalar_select %p396_p9, %s1985_s19, 3 }
  0x18   : > { %s2084_s10 = scalar_lea.vmem %s2572_s2, %s1850_s7  ;;  %451 = vst.msk [vmem:[#allocation4 + $0x10] sm:$0xff] (%p431_p12), %vm440_vm0, %v1999_v0  ;;  %452 = vst.msk [vmem:[#allocation4 + $0x18] sm:$0xff] (%p431_p12), %vm440_vm0, %v1999_v0 }
  0x19   : > { %s2595_s6 = smov (!%p396_p9, %s397_s6), 3  ;;  %453 = vst.msk [vmem:[#allocation4 + $0x20] sm:$0xff] (%p431_p12), %vm440_vm0, %v1999_v0  ;;  %454 = vst.msk [vmem:[#allocation4 + $0x28] sm:$0xff] (%p431_p12), %vm440_vm0, %v1999_v0 }
  0x1a   : > { %s415_s11 = scalar_select %p414_p11, %s1981_s18, 0 }
  0x1b   : > { %s1851_s12 = sshll.u32 %s2595_s6, 6  ;;  %439 = sbr.rel (!%p431_p12) target bundleno = 34 (0x22), region = 44  ;;  %455 = vst.msk [vmem:[#allocation4 + $0x30] sm:$0xff] (%p431_p12), %vm440_vm0, %v1999_v0  ;;  %456 = vst.msk [vmem:[#allocation4 + $0x38] sm:$0xff] (%p431_p12), %vm440_vm0, %v1999_v0 }
  0x1c   : > { %s2090_s15 = scalar_lea.vmem %s2573_s3, %s1851_s12  ;;  %s2095_s26 = scalar_lea.vmem %s2574_s4, %s1851_s12 }
  0x1d   : > { %p418_p0 = scmp.lt.s32.totalorder %s415_s11, 1 }
  0x1f   : > { %s2597_s11 = smov (!%p418_p0, %s415_s11), 1 }
  0x20   : > { %s1853_s25 = sshll.u32 %s2597_s11, 7 }
  0x21   : > { %s2100_s29 = scalar_lea.vmem %s2575_s5, %s1853_s25 }
  0x22 PF: > { %p1813_p1 = scmp.ne.s32.totalorder %s1985_s19, 0 }
  0x23   : > { %v461_v1 = vld [vmem:[%s2077_s30] sm:$0xff] (!%p1813_p1)  ;;  %vm497_vm1 = vcmask (!%p1813_p1), 1043456   ;;  %v2000_v3 = vmov (!%p1813_p1), 0.0   ;;  %vm472_vm2 = vcmask (!%p1813_p1), 31744   ;;  %v463_v6 = vld [vmem:[%s2571_s1 + $0x8] sm:$0xff] (!%p1813_p1)  ;;  %v464_v8 = vld [vmem:[%s2571_s1 + $0x10] sm:$0xff] (!%p1813_p1) }
  0x24   : > { %460 = sbr.rel (%p1813_p1) target bundleno = 575 (0x23f), region = 48  ;;  %v471_v2 = vcombine.high (!%p1813_p1), %v461_v1, %v461_v1  ;;  %566 = vmatprep.mubr.f32.mxu0 (!%p1813_p1), %v2000_v3  ;;  %590 = vmatprep.mubr.f32.mxu1 (!%p1813_p1), %v2000_v3  ;;  %v462_v4 = vld [vmem:[%s2571_s1] sm:$0xff] (!%p1813_p1)  ;;  %v467_v7 = vld [vmem:[%s2571_s1 + $0x28] sm:$0xff] (!%p1813_p1)  ;;  %v468_v9 = vld [vmem:[%s2571_s1 + $0x30] sm:$0xff] (!%p1813_p1)  ;;  %s1826_s8 = sshll.u32 (!%p1813_p1), %s1981_s18, 8  ;;  %vm763_vm3 = vcmask (!%p1813_p1), 7168  }
  0x25   : > { %v466_v5 = vld [vmem:[%s2571_s1 + $0x20] sm:$0xff] (!%p1813_p1)  ;;  %v465_v10 = vld [vmem:[%s2571_s1 + $0x18] sm:$0xff] (!%p1813_p1)  ;;  %s2155_s9 = scvt.s32.f32 (!%p1813_p1), %s1826_s8  ;;  %s1856_s11 = sshll.u32 (!%p1813_p1), %s1981_s18, 7  ;;  %v731_v45 = vld [vmem:[#allocation3 + $0x28] sm:$0xff] (!%p1813_p1) }
  0x26   : > { %1814 = vmatprep.subr.msk.mxu0 (!%p1813_p1), %vm497_vm1, %v471_v2  ;;  %1875 = vmatprep.subr.msk.mxu1 (!%p1813_p1), %vm497_vm1, %v471_v2  ;;  %v469_v11 = vld [vmem:[%s2571_s1 + $0x38] sm:$0xff] (!%p1813_p1)  ;;  %s2161_s12 = scalar_lea.vmem (!%p1813_p1), [#allocation2], %s1856_s11  ;;  %v726_v38 = vld [vmem:[#allocation3] sm:$0xff] (!%p1813_p1)  ;;  %v727_v60 = vld [vmem:[#allocation3 + $0x8] sm:$0xff] (!%p1813_p1) }
  0x27   : > { %1815 = vmatpush1.msk.msra.mxu0 (!%p1813_p1), %vm497_vm1, %v461_v1  ;;  %1876 = vmatpush1.msk.msra.mxu1 (!%p1813_p1), %vm497_vm1, %v461_v1  ;;  %s725_s30 = sadd.f32 (!%p1813_p1), 256.0, %s2155_s9  ;;  %v730_v47 = vld [vmem:[#allocation3 + $0x20] sm:$0xff] (!%p1813_p1)  ;;  %v728_v62 = vld [vmem:[#allocation3 + $0x10] sm:$0xff] (!%p1813_p1) }
  0x28   : > { %1816 = vmatmul.mubr.msk.f32.vlgmr.msra.gmra.mrb[0].mxu0 (!%p1813_p1), %vm472_vm2, %v462_v4  ;;  %1820 = vmatmul.mubr.msk.f32.vlgmr.msra.gmra.mrb[0].mxu1 (!%p1813_p1), %vm472_vm2, %v466_v5 }
  0x29   : > { %572 = vmatprep.mubr.f32.mxu0 (!%p1813_p1), %v2000_v3  ;;  %596 = vmatprep.mubr.f32.mxu1 (!%p1813_p1), %v2000_v3  ;;  %v742_v12 = vstv (!%p1813_p1), %s725_s30 }
  0x2a   : > { %1935 = vrcp.f32 (!%p1813_p1), %v742_v12 }
  0x2c   : > { %1817 = vmatmul.mubr.msk.f32.gmra.mrb[2].mxu0 %vm472_vm2, %v463_v6  ;;  %1821 = vmatmul.mubr.msk.f32.gmra.mrb[2].mxu1 %vm472_vm2, %v467_v7 }
  0x2d   : > { %578 = vmatprep.mubr.f32.mxu0 %v2000_v3  ;;  %602 = vmatprep.mubr.f32.mxu1 %v2000_v3 }
  0x30   : > { %1818 = vmatmul.mubr.msk.f32.gmra.mrb[4].mxu0 %vm472_vm2, %v464_v8  ;;  %1822 = vmatmul.mubr.msk.f32.gmra.mrb[4].mxu1 %vm472_vm2, %v468_v9 }
  0x31   : > { %584 = vmatprep.mubr.f32.mxu0 %v2000_v3  ;;  %608 = vmatprep.mubr.f32.mxu1 %v2000_v3 }
  0x34   : > { %1819 = vmatmul.mubr.msk.f32.gmra.mrb[6].mxu0 %vm472_vm2, %v465_v10  ;;  %1823 = vmatmul.mubr.msk.f32.gmra.mrb[6].mxu1 %vm472_vm2, %v469_v11  ;;  %v1936_v13 = vpop.eup %1935 }
  0x35   : > { %1885 = vpush %v1936_v13 }
  0x66   : > { %s1886_s13 = spop %1885 }
  0x67   : > { %s745_s14 = smul.f32 256.0, %s1886_s13 }
  0x69   : > { %v2233_v41 = vstv %s745_s14  ;;  %s796_s16 = smul.f32 %s745_s14, %s2155_s9 }
  0x6b   : > { %v2237_v53 = vstv %s796_s16 }
  0xfb   : > { %v568_v14 = vpop.f32.mrb[0].mxu0  ;;  %v2159_v15 = vpop.f32.mrb[0].mxu1 }
  0xfc   : > { %618 = vst [vmem:[%s2161_s12] sm:$0xff] %v568_v14  ;;  %v570_v16 = vpop.f32.mrb[1].mxu0  ;;  %626 = vst [vmem:[%s2161_s12 + $0x40] sm:$0xff] %v2159_v15  ;;  %v2166_v17 = vpop.f32.mrb[1].mxu1 }
  0xfd   : > { %619 = vst [vmem:[%s2161_s12 + $0x8] sm:$0xff] %v570_v16  ;;  %627 = vst [vmem:[%s2161_s12 + $0x48] sm:$0xff] %v2166_v17  ;;  %v634_v18 = vadd.f32 %v570_v16, %v568_v14  ;;  %v646_v19 = vadd.f32 %v2166_v17, %v2159_v15 }
  0xff   : > { %v2173_v20 = vpop.f32.mrb[2].mxu1  ;;  %635 = vadd.xlane.f32.xlu0 %v634_v18  ;;  %v2175_v21 = vpop.f32.mrb[2].mxu0  ;;  %v729_v18 = vld [vmem:[#allocation3 + $0x18] sm:$0xff] }
 0x100   : > { %628 = vst [vmem:[%s2161_s12 + $0x50] sm:$0xff] %v2173_v20  ;;  %v2179_v22 = vpop.f32.mrb[3].mxu1  ;;  %620 = vst [vmem:[%s2161_s12 + $0x10] sm:$0xff] %v2175_v21  ;;  %v2183_v23 = vpop.f32.mrb[3].mxu0 }
 0x101   : > { %629 = vst [vmem:[%s2161_s12 + $0x58] sm:$0xff] %v2179_v22  ;;  %621 = vst [vmem:[%s2161_s12 + $0x18] sm:$0xff] %v2183_v23  ;;  %v649_v24 = vadd.f32 %v2179_v22, %v2173_v20  ;;  %v637_v25 = vadd.f32 %v2183_v23, %v2175_v21 }
 0x103   : > { %650 = vadd.xlane.f32.xlu1 %v649_v24  ;;  %647 = vadd.xlane.f32.xlu0 %v646_v19  ;;  %v2193_v26 = vpop.f32.mrb[4].mxu0  ;;  %v2195_v27 = vpop.f32.mrb[4].mxu1 }
 0x104   : > { %622 = vst [vmem:[%s2161_s12 + $0x20] sm:$0xff] %v2193_v26  ;;  %v2199_v28 = vpop.f32.mrb[5].mxu0  ;;  %630 = vst [vmem:[%s2161_s12 + $0x60] sm:$0xff] %v2195_v27  ;;  %v2203_v29 = vpop.f32.mrb[5].mxu1 }
 0x105   : > { %623 = vst [vmem:[%s2161_s12 + $0x28] sm:$0xff] %v2199_v28  ;;  %v640_v30 = vadd.f32 %v2199_v28, %v2193_v26  ;;  %631 = vst [vmem:[%s2161_s12 + $0x68] sm:$0xff] %v2203_v29  ;;  %v652_v31 = vadd.f32 %v2203_v29, %v2195_v27 }
 0x107   : > { %638 = vadd.xlane.f32.xlu0 %v637_v25  ;;  %641 = vadd.xlane.f32.xlu1 %v640_v30  ;;  %v2213_v32 = vpop.f32.mrb[6].mxu0  ;;  %v2215_v33 = vpop.f32.mrb[6].mxu1 }
 0x108   : > { %624 = vst [vmem:[%s2161_s12 + $0x30] sm:$0xff] %v2213_v32  ;;  %v2219_v34 = vpop.f32.mrb[7].mxu0  ;;  %632 = vst [vmem:[%s2161_s12 + $0x70] sm:$0xff] %v2215_v33  ;;  %v2223_v35 = vpop.f32.mrb[7].mxu1 }
 0x109   : > { %625 = vst [vmem:[%s2161_s12 + $0x38] sm:$0xff] %v2219_v34  ;;  %v643_v36 = vadd.f32 %v2219_v34, %v2213_v32  ;;  %633 = vst [vmem:[%s2161_s12 + $0x78] sm:$0xff] %v2223_v35  ;;  %v655_v37 = vadd.f32 %v2223_v35, %v2215_v33 }
 0x10b   : > { %653 = vadd.xlane.f32.xlu0 %v652_v31  ;;  %644 = vadd.xlane.f32.xlu1 %v643_v36 }
 0x10f   : > { %656 = vadd.xlane.f32.xlu1 %v655_v37 }
 0x18c   : > { %v636_v39 = vpop.xlane.xlu0 %635 }
 0x18d   : > { %v659_v40 = vmul.f32 0.00390625, %v636_v39 }
 0x18f   : > { %v734_v42 = vsub.f32 %v659_v40, %v726_v38  ;;  %v667_v43 = vsub.f32 %v568_v14, %v659_v40  ;;  %v668_v44 = vsub.f32 %v570_v16, %v659_v40  ;;  %v732_v16 = vld [vmem:[#allocation3 + $0x30] sm:$0xff] }
 0x190   : > { %v651_v46 = vpop.xlane.xlu1 %650  ;;  %v648_v48 = vpop.xlane.xlu0 %647 }
 0x191   : > { %v747_v49 = vmul.f32 %v2233_v41, %v734_v42  ;;  %v664_v50 = vmul.f32 0.00390625, %v651_v46  ;;  %v663_v51 = vmul.f32 0.00390625, %v648_v48  ;;  %v683_v52 = vmul.f32 %v667_v43, %v667_v43 }
 0x192   : > { %v684_v54 = vmul.f32 %v668_v44, %v668_v44  ;;  %v2239_v55 = vmul.f32 %v734_v42, %v734_v42  ;;  %v733_v44 = vld [vmem:[#allocation3 + $0x38] sm:$0xff] }
 0x193   : > { %v755_v56 = vadd.f32 %v747_v49, %v726_v38  ;;  %v2241_v57 = vsub.f32 %v664_v50, %v731_v45  ;;  %v2243_v58 = vsub.f32 %v663_v51, %v730_v47  ;;  %v675_v59 = vsub.f32 %v2159_v15, %v663_v51 }
 0x194   : > { %v639_v61 = vpop.xlane.xlu0 %638  ;;  %v642_v63 = vpop.xlane.xlu1 %641  ;;  %v699_v0 = vadd.f32 %v684_v54, %v683_v52  ;;  %v676_v1 = vsub.f32 %v2166_v17, %v663_v51  ;;  %v677_v2 = vsub.f32 %v2173_v20, %v664_v50  ;;  %v678_v3 = vsub.f32 %v2179_v22, %v664_v50 }
 0x195   : > { %764 = vst.msk [vmem:[#allocation3] sm:$0xff] %vm763_vm3, %v755_v56  ;;  %v752_v4 = vmul.f32 %v2233_v41, %v2241_v57  ;;  %v751_v5 = vmul.f32 %v2233_v41, %v2243_v58  ;;  %v660_v6 = vmul.f32 0.00390625, %v639_v61  ;;  %v661_v7 = vmul.f32 0.00390625, %v642_v63 }
 0x196   : > { %700 = vadd.xlane.f32.xlu0 %v699_v0  ;;  %v691_v8 = vmul.f32 %v675_v59, %v675_v59  ;;  %v692_v9 = vmul.f32 %v676_v1, %v676_v1  ;;  %v693_v10 = vmul.f32 %v677_v2, %v677_v2  ;;  %v694_v11 = vmul.f32 %v678_v3, %v678_v3 }
 0x197   : > { %v760_v12 = vadd.f32 %v752_v4, %v731_v45  ;;  %v759_v13 = vadd.f32 %v751_v5, %v730_v47  ;;  %v735_v14 = vsub.f32 %v660_v6, %v727_v60  ;;  %v736_v15 = vsub.f32 %v661_v7, %v728_v62 }
 0x198   : > { %v654_v17 = vpop.xlane.xlu0 %653  ;;  %v645_v19 = vpop.xlane.xlu1 %644  ;;  %v711_v20 = vadd.f32 %v692_v9, %v691_v8  ;;  %v671_v22 = vsub.f32 %v2193_v26, %v661_v7  ;;  %v672_v24 = vsub.f32 %v2199_v28, %v661_v7  ;;  %v669_v25 = vsub.f32 %v2175_v21, %v660_v6 }
 0x199   : > { %769 = vst.msk [vmem:[#allocation3 + $0x28] sm:$0xff] %vm763_vm3, %v760_v12  ;;  %768 = vst.msk [vmem:[#allocation3 + $0x20] sm:$0xff] %vm763_vm3, %v759_v13  ;;  %v748_v30 = vmul.f32 %v2233_v41, %v735_v14  ;;  %v749_v31 = vmul.f32 %v2233_v41, %v736_v15  ;;  %v665_v36 = vmul.f32 0.00390625, %v654_v17  ;;  %v662_v37 = vmul.f32 0.00390625, %v645_v19 }
 0x19a   : > { %712 = vadd.xlane.f32.xlu0 %v711_v20  ;;  %v687_v38 = vmul.f32 %v671_v22, %v671_v22  ;;  %v688_v39 = vmul.f32 %v672_v24, %v672_v24  ;;  %v670_v40 = vsub.f32 %v2183_v23, %v660_v6  ;;  %v685_v26 = vmul.f32 %v669_v25, %v669_v25  ;;  %v776_v22 = vld [vmem:[#allocation4 + $0x20] sm:$0xff] }
 0x19b   : > { %v756_v42 = vadd.f32 %v748_v30, %v727_v60  ;;  %v757_v28 = vadd.f32 %v749_v31, %v728_v62  ;;  %v740_v43 = vsub.f32 %v665_v36, %v732_v16  ;;  %v737_v21 = vsub.f32 %v662_v37, %v729_v18  ;;  %v774_v30 = vld [vmem:[#allocation4 + $0x10] sm:$0xff] }
 0x19c   : > { %v657_v45 = vpop.xlane.xlu1 %656  ;;  %v705_v46 = vadd.f32 %v688_v39, %v687_v38  ;;  %v686_v47 = vmul.f32 %v670_v40, %v670_v40  ;;  %v679_v48 = vsub.f32 %v2195_v27, %v665_v36  ;;  %v680_v49 = vsub.f32 %v2203_v29, %v665_v36 }
 0x19d   : > { %765 = vst.msk [vmem:[#allocation3 + $0x8] sm:$0xff] %vm763_vm3, %v756_v42  ;;  %766 = vst.msk [vmem:[#allocation3 + $0x10] sm:$0xff] %vm763_vm3, %v757_v28  ;;  %v753_v50 = vmul.f32 %v2233_v41, %v740_v43  ;;  %v750_v23 = vmul.f32 %v2233_v41, %v737_v21  ;;  %v666_v51 = vmul.f32 0.00390625, %v657_v45  ;;  %v714_v52 = vadd.f32 %v694_v11, %v693_v10  ;;  %v777_v28 = vld [vmem:[#allocation4 + $0x28] sm:$0xff] }
 0x19e   : > { %706 = vadd.xlane.f32.xlu0 %v705_v46  ;;  %v702_v54 = vadd.f32 %v686_v47, %v685_v26  ;;  %v695_v56 = vmul.f32 %v679_v48, %v679_v48  ;;  %v696_v59 = vmul.f32 %v680_v49, %v680_v49  ;;  %v673_v60 = vsub.f32 %v2213_v32, %v662_v37  ;;  %v775_v47 = vld [vmem:[#allocation4 + $0x18] sm:$0xff] }
 0x19f   : > { %v761_v61 = vadd.f32 %v753_v50, %v732_v16  ;;  %v758_v27 = vadd.f32 %v750_v23, %v729_v18  ;;  %v741_v62 = vsub.f32 %v666_v51, %v733_v44  ;;  %v674_v29 = vsub.f32 %v2219_v34, %v662_v37  ;;  %v772_v18 = vld [vmem:[#allocation4] sm:$0xff]  ;;  %v773_v37 = vld [vmem:[#allocation4 + $0x8] sm:$0xff]  ;;  %v779_v23 = vld [vmem:[#allocation4 + $0x38] sm:$0xff] }
 0x1a0   : > { %703 = vadd.xlane.f32.xlu1 %v702_v54  ;;  %v717_v63 = vadd.f32 %v696_v59, %v695_v56  ;;  %v689_v0 = vmul.f32 %v673_v60, %v673_v60  ;;  %v681_v1 = vsub.f32 %v2215_v33, %v666_v51  ;;  %v682_v2 = vsub.f32 %v2223_v35, %v666_v51 }
 0x1a1   : > { %770 = vst.msk [vmem:[#allocation3 + $0x30] sm:$0xff] %vm763_vm3, %v761_v61  ;;  %767 = vst.msk [vmem:[#allocation3 + $0x18] sm:$0xff] %vm763_vm3, %v758_v27  ;;  %v754_v3 = vmul.f32 %v2233_v41, %v741_v62  ;;  %v690_v4 = vmul.f32 %v674_v29, %v674_v29  ;;  %v798_v32 = vmul.f32 %v2237_v53, %v2239_v55 }
 0x1a2   : > { %v792_v34 = vmul.f32 %v2243_v58, %v2243_v58  ;;  %718 = vadd.xlane.f32.xlu0 %v717_v63  ;;  %v697_v5 = vmul.f32 %v681_v1, %v681_v1  ;;  %v698_v6 = vmul.f32 %v682_v2, %v682_v2  ;;  %v790_v7 = vmul.f32 %v736_v15, %v736_v15 }
 0x1a3   : > { %v789_v33 = vmul.f32 %v735_v14, %v735_v14  ;;  %v762_v8 = vadd.f32 %v754_v3, %v733_v44  ;;  %v708_v35 = vadd.f32 %v690_v4, %v689_v0  ;;  %v794_v10 = vmul.f32 %v740_v43, %v740_v43 }
 0x1a4   : > { %v802_v9 = vmul.f32 %v2237_v53, %v792_v34  ;;  %715 = vadd.xlane.f32.xlu1 %v714_v52  ;;  %v720_v11 = vadd.f32 %v698_v6, %v697_v5  ;;  %v800_v41 = vmul.f32 %v2237_v53, %v790_v7  ;;  %v793_v55 = vmul.f32 %v2241_v57, %v2241_v57 }
 0x1a5   : > { %v799_v12 = vmul.f32 %v2237_v53, %v789_v33  ;;  %771 = vst.msk [vmem:[#allocation3 + $0x38] sm:$0xff] %vm763_vm3, %v762_v8  ;;  %v804_v58 = vmul.f32 %v2237_v53, %v794_v10  ;;  %v791_v13 = vmul.f32 %v737_v21, %v737_v21  ;;  %v795_v14 = vmul.f32 %v741_v62, %v741_v62 }
 0x1a6   : > { %v803_v15 = vmul.f32 %v2237_v53, %v793_v55 }
 0x1a7   : > { %v801_v16 = vmul.f32 %v2237_v53, %v791_v13  ;;  %v805_v17 = vmul.f32 %v2237_v53, %v795_v14  ;;  %v778_v53 = vld [vmem:[#allocation4 + $0x30] sm:$0xff] }
 0x1a8   : > { %709 = vadd.xlane.f32.xlu1 %v708_v35 }
 0x1ac   : > { %721 = vadd.xlane.f32.xlu1 %v720_v11 }
 0x223   : > { %v701_v19 = vpop.xlane.xlu0 %700 }
 0x224   : > { %v780_v20 = vadd.f32 %v772_v18, %v701_v19 }
 0x226   : > { %v806_v24 = vadd.f32 %v798_v32, %v780_v20 }
 0x227   : > { %v713_v57 = vpop.xlane.xlu0 %712 }
 0x228   : > { %814 = vst.msk [vmem:[#allocation4] sm:$0xff] %vm763_vm3, %v806_v24  ;;  %v784_v25 = vadd.f32 %v776_v22, %v713_v57 }
 0x22a   : > { %v810_v31 = vadd.f32 %v802_v9, %v784_v25 }
 0x22b   : > { %v707_v36 = vpop.xlane.xlu0 %706 }
 0x22c   : > { %818 = vst.msk [vmem:[#allocation4 + $0x20] sm:$0xff] %vm763_vm3, %v810_v31  ;;  %v782_v38 = vadd.f32 %v774_v30, %v707_v36 }
 0x22d   : > { %v704_v39 = vpop.xlane.xlu1 %703 }
 0x22e   : > { %v808_v40 = vadd.f32 %v800_v41, %v782_v38  ;;  %v781_v26 = vadd.f32 %v773_v37, %v704_v39 }
 0x22f   : > { %v719_v42 = vpop.xlane.xlu0 %718 }
 0x230   : > { %816 = vst.msk [vmem:[#allocation4 + $0x10] sm:$0xff] %vm763_vm3, %v808_v40  ;;  %v807_v43 = vadd.f32 %v799_v12, %v781_v26  ;;  %v786_v21 = vadd.f32 %v778_v53, %v719_v42 }
 0x231   : > { %v716_v44 = vpop.xlane.xlu1 %715 }
 0x232   : > { %815 = vst.msk [vmem:[#allocation4 + $0x8] sm:$0xff] %vm763_vm3, %v807_v43  ;;  %v812_v45 = vadd.f32 %v804_v58, %v786_v21  ;;  %v785_v46 = vadd.f32 %v777_v28, %v716_v44 }
 0x234   : > { %820 = vst.msk [vmem:[#allocation4 + $0x30] sm:$0xff] %vm763_vm3, %v812_v45  ;;  %v811_v48 = vadd.f32 %v803_v15, %v785_v46 }
 0x235   : > { %v710_v49 = vpop.xlane.xlu1 %709 }
 0x236   : > { %819 = vst.msk [vmem:[#allocation4 + $0x28] sm:$0xff] %vm763_vm3, %v811_v48  ;;  %v783_v50 = vadd.f32 %v775_v47, %v710_v49 }
 0x238   : > { %v809_v51 = vadd.f32 %v801_v16, %v783_v50 }
 0x239   : > { %v722_v52 = vpop.xlane.xlu1 %721 }
 0x23a   : > { %817 = vst.msk [vmem:[#allocation4 + $0x18] sm:$0xff] %vm763_vm3, %v809_v51  ;;  %v787_v54 = vadd.f32 %v779_v23, %v722_v52 }
 0x23c   : > { %v813_v56 = vadd.f32 %v805_v17, %v787_v54 }
 0x23e   : > { %821 = vst.msk [vmem:[#allocation4 + $0x38] sm:$0xff] %vm763_vm3, %v813_v56 }
 0x23f PF: > { %p822_p2 = scmp.ge.s32.totalorder %s1985_s19, 1  ;;  %p823_p3 = scmp.le.s32.totalorder %s1985_s19, 3 }
 0x241   : > { %p824_p4 = pnand %p823_p3, %p822_p2 }
 0x242   : > { %v911_v59 = vld [vmem:[#allocation6] sm:$0xff] (!%p824_p4)  ;;  %v2001_v61 = vmov (!%p824_p4), 0   ;;  %v912_v27 = vld [vmem:[#allocation6 + $0x8] sm:$0xff] (!%p824_p4)  ;;  %v850_v29 = vld [vmem:[#allocation5 + $0x18] sm:$0xff] (!%p824_p4)  ;;  %v2002_v33 = vmov (!%p824_p4), 0.0   ;;  %s1857_s17 = sshll.u32 (!%p824_p4), %s1981_s18, 7 }
 0x243   : > { %827 = sbr.rel (%p824_p4) target bundleno = 1276 (0x4fc), region = 52  ;;  %v847_v60 = vld [vmem:[#allocation5] sm:$0xff] (!%p824_p4)  ;;  %1938 = vset.pattern.permute.xlu1 (!%p824_p4), %v2001_v61  ;;  %1937 = vset.pattern.permute.xlu0 (!%p824_p4), %v2001_v61  ;;  %v848_v62 = vld [vmem:[#allocation5 + $0x8] sm:$0xff] (!%p824_p4)  ;;  %v849_v63 = vld [vmem:[#allocation5 + $0x10] sm:$0xff] (!%p824_p4)  ;;  %s2304_s25 = scalar_lea.vmem (!%p824_p4), [#allocation2], %s1857_s17  ;;  %vm999_vm4 = vcmask (!%p824_p4), 523264  }
 0x244   : > { %921 = vperm.xlu1 (!%p824_p4), %1938, %v911_v59   ;;  %857 = vperm.xlu0 (!%p824_p4), %1937, %v847_v60   ;;  %v914_v0 = vld [vmem:[#allocation6 + $0x18] sm:$0xff] (!%p824_p4)  ;;  %v913_v1 = vld [vmem:[#allocation6 + $0x10] sm:$0xff] (!%p824_p4)  ;;  %v852_v2 = vld [vmem:[#allocation5 + $0x28] sm:$0xff] (!%p824_p4)  ;;  %s1837_s27 = sshll.u32 (!%p824_p4), %s1981_s18, 8  ;;  %vm1282_vm5 = vcmask (!%p824_p4), 7168  }
 0x245   : > { %v851_v3 = vld [vmem:[#allocation5 + $0x20] sm:$0xff] (!%p824_p4)  ;;  %v916_v4 = vld [vmem:[#allocation6 + $0x28] sm:$0xff] (!%p824_p4)  ;;  %v854_v34 = vld [vmem:[#allocation5 + $0x38] sm:$0xff] (!%p824_p4)  ;;  %1088 = vmatprep.mubr.f32.mxu0 (!%p824_p4), %v2002_v33  ;;  %1112 = vmatprep.mubr.f32.mxu1 (!%p824_p4), %v2002_v33  ;;  %s2345_s28 = scvt.s32.f32 (!%p824_p4), %s1837_s27 }
 0x246   : > { %v915_v32 = vld [vmem:[#allocation6 + $0x20] sm:$0xff] (!%p824_p4)  ;;  %v853_v5 = vld [vmem:[#allocation5 + $0x30] sm:$0xff] (!%p824_p4)  ;;  %v918_v6 = vld [vmem:[#allocation6 + $0x38] sm:$0xff] (!%p824_p4) }
 0x247   : > { %v917_v7 = vld [vmem:[#allocation6 + $0x30] sm:$0xff] (!%p824_p4)  ;;  %v831_v8 = vld [vmem:[%s2304_s25] sm:$0xff] (!%p824_p4)  ;;  %v832_v35 = vld [vmem:[%s2304_s25 + $0x8] sm:$0xff] (!%p824_p4)  ;;  %s1244_s6 = sadd.f32 (!%p824_p4), 256.0, %s2345_s28 }
 0x248   : > { %926 = vperm.xlu1 (!%p824_p4), %1938, %v912_v27   ;;  %862 = vperm.xlu0 (!%p824_p4), %1937, %v848_v62   ;;  %v833_v12 = vld [vmem:[%s2304_s25 + $0x10] sm:$0xff] (!%p824_p4)  ;;  %v834_v55 = vld [vmem:[%s2304_s25 + $0x18] sm:$0xff] (!%p824_p4)  ;;  %v835_v25 = vld [vmem:[%s2304_s25 + $0x20] sm:$0xff] (!%p824_p4) }
 0x249   : > { %v837_v20 = vld [vmem:[%s2304_s25 + $0x30] sm:$0xff] (!%p824_p4)  ;;  %v838_v24 = vld [vmem:[%s2304_s25 + $0x38] sm:$0xff] (!%p824_p4)  ;;  %v836_v30 = vld [vmem:[%s2304_s25 + $0x28] sm:$0xff] (!%p824_p4) }
 0x24a   : > { %v841_v51 = vld [vmem:[%s2304_s25 + $0x50] sm:$0xff]  ;;  %v842_v54 = vld [vmem:[%s2304_s25 + $0x58] sm:$0xff]  ;;  %v839_v59 = vld [vmem:[%s2304_s25 + $0x40] sm:$0xff] }
 0x24b   : > { %v840_v60 = vld [vmem:[%s2304_s25 + $0x48] sm:$0xff] }
 0x24c   : > { %872 = vperm.xlu1 %1938, %v850_v29   ;;  %867 = vperm.xlu0 %1937, %v849_v63  }
 0x250   : > { %936 = vperm.xlu1 %1938, %v914_v0   ;;  %931 = vperm.xlu0 %1937, %v913_v1  }
 0x254   : > { %882 = vperm.xlu1 %1938, %v852_v2   ;;  %877 = vperm.xlu0 %1937, %v851_v3  }
 0x258   : > { %946 = vperm.xlu1 %1938, %v916_v4   ;;  %941 = vperm.xlu0 %1937, %v915_v32  }
 0x25c   : > { %892 = vperm.xlu1 %1938, %v854_v34   ;;  %887 = vperm.xlu0 %1937, %v853_v5  }
 0x260   : > { %956 = vperm.xlu1 %1938, %v918_v6   ;;  %951 = vperm.xlu0 %1937, %v917_v7  }
 0x2c3   : > { %v922_v9 = vpop.permute.xlu1 %921  ;;  %v858_v10 = vpop.permute.xlu0 %857 }
 0x2c4   : > { %v895_v11 = vmul.f32 %v858_v10, %v831_v8  ;;  %v896_v41 = vmul.f32 %v858_v10, %v832_v35  ;;  %v845_v35 = vld [vmem:[%s2304_s25 + $0x70] sm:$0xff]  ;;  %v846_v10 = vld [vmem:[%s2304_s25 + $0x78] sm:$0xff] }
 0x2c6   : > { %v959_v16 = vadd.f32 %v922_v9, %v895_v11  ;;  %v960_v17 = vadd.f32 %v922_v9, %v896_v41  ;;  %v843_v41 = vld [vmem:[%s2304_s25 + $0x60] sm:$0xff] }
 0x2c7   : > { %v927_v58 = vpop.permute.xlu1 %926  ;;  %v863_v13 = vpop.permute.xlu0 %862 }
 0x2c8   : > { %v897_v14 = vmul.f32 %v863_v13, %v833_v12  ;;  %v898_v15 = vmul.f32 %v863_v13, %v834_v55  ;;  %v976_v31 = vmax.f32 %v960_v17, 0.0  ;;  %v975_v37 = vmax.f32 %v959_v16, 0.0  ;;  %v844_v12 = vld [vmem:[%s2304_s25 + $0x68] sm:$0xff] }
 0x2ca   : > { %v961_v18 = vadd.f32 %v927_v58, %v897_v14  ;;  %v962_v19 = vadd.f32 %v927_v58, %v898_v15 }
 0x2cb   : > { %v873_v22 = vpop.permute.xlu1 %872  ;;  %v868_v57 = vpop.permute.xlu0 %867 }
 0x2cc   : > { %v978_v36 = vmax.f32 %v962_v19, 0.0  ;;  %v977_v38 = vmax.f32 %v961_v18, 0.0  ;;  %v901_v39 = vmul.f32 %v873_v22, %v837_v20  ;;  %v902_v53 = vmul.f32 %v873_v22, %v838_v24 }
 0x2cd   : > { %v899_v40 = vmul.f32 %v868_v57, %v835_v25  ;;  %v900_v26 = vmul.f32 %v868_v57, %v836_v30 }
 0x2ce   : > { %v1859_v43 = vpack.c.bf16 %v978_v36, %v976_v31  ;;  %v1861_v21 = vpack.c.bf16 %v977_v38, %v975_v37  ;;  %v991_v38 = vld [vmem:[%s2084_s10] sm:$0xff] }
 0x2cf   : > { %v937_v42 = vpop.permute.xlu1 %936  ;;  %v932_v28 = vpop.permute.xlu0 %931 }
 0x2d0   : > { %v965_v44 = vadd.f32 %v937_v42, %v901_v39  ;;  %v966_v45 = vadd.f32 %v937_v42, %v902_v53  ;;  %v963_v46 = vadd.f32 %v932_v28, %v899_v40  ;;  %v964_v47 = vadd.f32 %v932_v28, %v900_v26  ;;  %1860 = vmatprep.subr.bf16.mxu0 %v1859_v43  ;;  %v995_v39 = vld [vmem:[%s2084_s10 + $0x20] sm:$0xff]  ;;  %v992_v53 = vld [vmem:[%s2084_s10 + $0x8] sm:$0xff]  ;;  %v993_v26 = vld [vmem:[%s2084_s10 + $0x10] sm:$0xff] }
 0x2d1   : > { %1877 = vmatprep.subr.bf16.mxu1 %v1859_v43  ;;  %1862 = vmatpush1.bf16.msra.mxu0 %v1861_v21  ;;  %v996_v40 = vld [vmem:[%s2084_s10 + $0x28] sm:$0xff]  ;;  %v997_v42 = vld [vmem:[%s2084_s10 + $0x30] sm:$0xff]  ;;  %v994_v28 = vld [vmem:[%s2084_s10 + $0x18] sm:$0xff] }
 0x2d2   : > { %v981_v48 = vmax.f32 %v965_v44, 0.0  ;;  %v982_v49 = vmax.f32 %v966_v45, 0.0  ;;  %v979_v50 = vmax.f32 %v963_v46, 0.0  ;;  %v980_v23 = vmax.f32 %v964_v47, 0.0  ;;  %1881 = vmatpush1.bf16.msra.mxu1 %v1861_v21  ;;  %v998_v43 = vld [vmem:[%s2084_s10 + $0x38] sm:$0xff] }
 0x2d3   : > { %v883_v52 = vpop.permute.xlu1 %882  ;;  %v878_v56 = vpop.permute.xlu0 %877  ;;  %v1261_v21 = vstv %s1244_s6 }
 0x2d4   : > { %v1863_v61 = vpack.c.bf16 %v982_v49, %v980_v23  ;;  %v1865_v27 = vpack.c.bf16 %v981_v48, %v979_v50  ;;  %v905_v62 = vmul.f32 %v883_v52, %v841_v51  ;;  %v906_v29 = vmul.f32 %v883_v52, %v842_v54 }
 0x2d5   : > { %v903_v63 = vmul.f32 %v878_v56, %v839_v59  ;;  %v904_v0 = vmul.f32 %v878_v56, %v840_v60  ;;  %1939 = vrcp.f32 %v1261_v21 }
 0x2d6   : > { %1864 = vmatprep.subr.bf16.mxu0 %v1863_v61  ;;  %1878 = vmatprep.subr.bf16.mxu1 %v1863_v61 }
 0x2d7   : > { %v947_v1 = vpop.permute.xlu1 %946  ;;  %v942_v2 = vpop.permute.xlu0 %941  ;;  %1866 = vmatpush1.bf16.msra.mxu0 %v1865_v27  ;;  %1882 = vmatpush1.bf16.msra.mxu1 %v1865_v27 }
 0x2d8   : > { %v969_v3 = vadd.f32 %v947_v1, %v905_v62  ;;  %v970_v4 = vadd.f32 %v947_v1, %v906_v29  ;;  %v967_v32 = vadd.f32 %v942_v2, %v903_v63  ;;  %v968_v34 = vadd.f32 %v942_v2, %v904_v0 }
 0x2da   : > { %v985_v5 = vmax.f32 %v969_v3, 0.0  ;;  %v986_v6 = vmax.f32 %v970_v4, 0.0  ;;  %v983_v7 = vmax.f32 %v967_v32, 0.0  ;;  %v984_v8 = vmax.f32 %v968_v34, 0.0  ;;  %v1249_v32 = vld [vmem:[#allocation3 + $0x20] sm:$0xff] }
 0x2db   : > { %v893_v9 = vpop.permute.xlu1 %892  ;;  %v888_v11 = vpop.permute.xlu0 %887 }
 0x2dc   : > { %v1867_v55 = vpack.c.bf16 %v986_v6, %v984_v8  ;;  %v1869_v58 = vpack.c.bf16 %v985_v5, %v983_v7  ;;  %v909_v13 = vmul.f32 %v893_v9, %v845_v35  ;;  %v910_v14 = vmul.f32 %v893_v9, %v846_v10  ;;  %v1245_v5 = vld [vmem:[#allocation3] sm:$0xff] }
 0x2dd   : > { %v907_v15 = vmul.f32 %v888_v11, %v843_v41  ;;  %v908_v16 = vmul.f32 %v888_v11, %v844_v12  ;;  %v1250_v12 = vld [vmem:[#allocation3 + $0x28] sm:$0xff] }
 0x2de   : > { %1868 = vmatprep.subr.bf16.mxu0 %v1867_v55  ;;  %1879 = vmatprep.subr.bf16.mxu1 %v1867_v55 }
 0x2df   : > { %v957_v17 = vpop.permute.xlu1 %956  ;;  %v952_v18 = vpop.permute.xlu0 %951  ;;  %1870 = vmatpush1.bf16.msra.mxu0 %v1869_v58  ;;  %1883 = vmatpush1.bf16.msra.mxu1 %v1869_v58  ;;  %v1246_v58 = vld [vmem:[#allocation3 + $0x8] sm:$0xff] }
 0x2e0   : > { %v973_v19 = vadd.f32 %v957_v17, %v909_v13  ;;  %v974_v20 = vadd.f32 %v957_v17, %v910_v14  ;;  %v971_v22 = vadd.f32 %v952_v18, %v907_v15  ;;  %v972_v24 = vadd.f32 %v952_v18, %v908_v16  ;;  %v1940_v44 = vpop.eup %1939 }
 0x2e1   : > { %1887 = vpush %v1940_v44 }
 0x2e2   : > { %v989_v57 = vmax.f32 %v973_v19, 0.0  ;;  %v990_v25 = vmax.f32 %v974_v20, 0.0  ;;  %v987_v30 = vmax.f32 %v971_v22, 0.0  ;;  %v988_v31 = vmax.f32 %v972_v24, 0.0 }
 0x2e4   : > { %v1871_v36 = vpack.c.bf16 %v990_v25, %v988_v31  ;;  %v1873_v37 = vpack.c.bf16 %v989_v57, %v987_v30 }
 0x2e6   : > { %1872 = vmatprep.subr.bf16.mxu0 %v1871_v36  ;;  %1880 = vmatprep.subr.bf16.mxu1 %v1871_v36 }
 0x2e7   : > { %1874 = vmatpush1.bf16.msra.mxu0 %v1873_v37  ;;  %1884 = vmatpush1.bf16.msra.mxu1 %v1873_v37  ;;  %v1251_v37 = vld [vmem:[#allocation3 + $0x30] sm:$0xff] }
 0x2ea   : > { %1829 = vmatmul.mubr.msk.f32.vlgmr.msra.gmra.mrb[0].mxu0 %vm999_vm4, %v991_v38  ;;  %1833 = vmatmul.mubr.msk.f32.vlgmr.msra.gmra.mrb[0].mxu1 %vm999_vm4, %v995_v39  ;;  %v1247_v39 = vld [vmem:[#allocation3 + $0x10] sm:$0xff] }
 0x2eb   : > { %1094 = vmatprep.mubr.f32.mxu0 %v2002_v33  ;;  %1118 = vmatprep.mubr.f32.mxu1 %v2002_v33 }
 0x2ee   : > { %1830 = vmatmul.mubr.msk.f32.gmra.mrb[2].mxu0 %vm999_vm4, %v992_v53  ;;  %1834 = vmatmul.mubr.msk.f32.gmra.mrb[2].mxu1 %vm999_vm4, %v996_v40 }
 0x2ef   : > { %1100 = vmatprep.mubr.f32.mxu0 %v2002_v33  ;;  %1124 = vmatprep.mubr.f32.mxu1 %v2002_v33 }
 0x2f2   : > { %1831 = vmatmul.mubr.msk.f32.gmra.mrb[4].mxu0 %vm999_vm4, %v993_v26  ;;  %1835 = vmatmul.mubr.msk.f32.gmra.mrb[4].mxu1 %vm999_vm4, %v997_v42 }
 0x2f3   : > { %1106 = vmatprep.mubr.f32.mxu0 %v2002_v33  ;;  %1130 = vmatprep.mubr.f32.mxu1 %v2002_v33 }
 0x2f6   : > { %1832 = vmatmul.mubr.msk.f32.gmra.mrb[6].mxu0 %vm999_vm4, %v994_v28  ;;  %1836 = vmatmul.mubr.msk.f32.gmra.mrb[6].mxu1 %vm999_vm4, %v998_v43 }
 0x312   : > { %s2416_s10 = spop %1887 }
 0x313   : > { %s1264_s7 = smul.f32 256.0, %s2416_s10 }
 0x315   : > { %v2421_v35 = vstv %s1264_s7  ;;  %s1315_s8 = smul.f32 %s1264_s7, %s2345_s28 }
 0x3bd   : > { %v1090_v45 = vpop.f32.mrb[0].mxu0  ;;  %v2348_v33 = vpop.f32.mrb[0].mxu1 }
 0x3be   : > { %1137 = vst [vmem:[%s2304_s25] sm:$0xff] %v1090_v45  ;;  %1145 = vst [vmem:[%s2304_s25 + $0x40] sm:$0xff] %v2348_v33  ;;  %v1092_v46 = vpop.f32.mrb[1].mxu0  ;;  %v1116_v47 = vpop.f32.mrb[1].mxu1 }
 0x3bf   : > { %1138 = vst [vmem:[%s2304_s25 + $0x8] sm:$0xff] %v1092_v46  ;;  %1146 = vst [vmem:[%s2304_s25 + $0x48] sm:$0xff] %v1116_v47  ;;  %v1165_v48 = vadd.f32 %v1116_v47, %v2348_v33  ;;  %v1153_v49 = vadd.f32 %v1092_v46, %v1090_v45 }
 0x3c1   : > { %1166 = vadd.xlane.f32.xlu1 %v1165_v48  ;;  %v2356_v50 = vpop.f32.mrb[2].mxu1  ;;  %1154 = vadd.xlane.f32.xlu0 %v1153_v49  ;;  %v2358_v23 = vpop.f32.mrb[2].mxu0 }
 0x3c2   : > { %1147 = vst [vmem:[%s2304_s25 + $0x50] sm:$0xff] %v2356_v50  ;;  %1139 = vst [vmem:[%s2304_s25 + $0x10] sm:$0xff] %v2358_v23  ;;  %v2364_v51 = vpop.f32.mrb[3].mxu0  ;;  %v2366_v52 = vpop.f32.mrb[3].mxu1 }
 0x3c3   : > { %1140 = vst [vmem:[%s2304_s25 + $0x18] sm:$0xff] %v2364_v51  ;;  %1148 = vst [vmem:[%s2304_s25 + $0x58] sm:$0xff] %v2366_v52  ;;  %v1168_v54 = vadd.f32 %v2366_v52, %v2356_v50  ;;  %v1156_v56 = vadd.f32 %v2364_v51, %v2358_v23 }
 0x3c5   : > { %v2376_v59 = vpop.f32.mrb[4].mxu1  ;;  %1169 = vadd.xlane.f32.xlu0 %v1168_v54  ;;  %1157 = vadd.xlane.f32.xlu1 %v1156_v56  ;;  %v2378_v60 = vpop.f32.mrb[4].mxu0  ;;  %v1248_v56 = vld [vmem:[#allocation3 + $0x18] sm:$0xff] }
 0x3c6   : > { %1149 = vst [vmem:[%s2304_s25 + $0x60] sm:$0xff] %v2376_v59  ;;  %1141 = vst [vmem:[%s2304_s25 + $0x20] sm:$0xff] %v2378_v60  ;;  %v2384_v61 = vpop.f32.mrb[5].mxu0  ;;  %v2386_v27 = vpop.f32.mrb[5].mxu1 }
 0x3c7   : > { %1142 = vst [vmem:[%s2304_s25 + $0x28] sm:$0xff] %v2384_v61  ;;  %1150 = vst [vmem:[%s2304_s25 + $0x68] sm:$0xff] %v2386_v27  ;;  %v1171_v62 = vadd.f32 %v2386_v27, %v2376_v59  ;;  %v1159_v29 = vadd.f32 %v2384_v61, %v2378_v60 }
 0x3c9   : > { %1172 = vadd.xlane.f32.xlu1 %v1171_v62  ;;  %1160 = vadd.xlane.f32.xlu0 %v1159_v29  ;;  %v2396_v63 = vpop.f32.mrb[6].mxu0  ;;  %v2398_v0 = vpop.f32.mrb[6].mxu1 }
 0x3ca   : > { %1143 = vst [vmem:[%s2304_s25 + $0x30] sm:$0xff] %v2396_v63  ;;  %v2402_v1 = vpop.f32.mrb[7].mxu0  ;;  %1151 = vst [vmem:[%s2304_s25 + $0x70] sm:$0xff] %v2398_v0  ;;  %v2406_v2 = vpop.f32.mrb[7].mxu1 }
 0x3cb   : > { %1144 = vst [vmem:[%s2304_s25 + $0x38] sm:$0xff] %v2402_v1  ;;  %1152 = vst [vmem:[%s2304_s25 + $0x78] sm:$0xff] %v2406_v2  ;;  %v1162_v3 = vadd.f32 %v2402_v1, %v2396_v63  ;;  %v1174_v4 = vadd.f32 %v2406_v2, %v2398_v0 }
 0x3cd   : > { %1163 = vadd.xlane.f32.xlu0 %v1162_v3 }
 0x3d1   : > { %1175 = vadd.xlane.f32.xlu0 %v1174_v4 }
 0x44e   : > { %v1167_v34 = vpop.xlane.xlu1 %1166  ;;  %v1155_v6 = vpop.xlane.xlu0 %1154 }
 0x44f   : > { %v1182_v7 = vmul.f32 0.00390625, %v1167_v34  ;;  %v1178_v8 = vmul.f32 0.00390625, %v1155_v6  ;;  %v1316_v6 = vstv %s1315_s8 }
 0x451   : > { %v2423_v9 = vsub.f32 %v1182_v7, %v1249_v32  ;;  %v2425_v10 = vsub.f32 %v1178_v8, %v1245_v5  ;;  %v1186_v11 = vsub.f32 %v1090_v45, %v1178_v8  ;;  %v1187_v41 = vsub.f32 %v1092_v46, %v1178_v8 }
 0x452   : > { %v1170_v55 = vpop.xlane.xlu0 %1169  ;;  %v1158_v13 = vpop.xlane.xlu1 %1157  ;;  %v1194_v14 = vsub.f32 %v2348_v33, %v1182_v7  ;;  %v1195_v15 = vsub.f32 %v1116_v47, %v1182_v7 }
 0x453   : > { %v1266_v16 = vmul.f32 %v2421_v35, %v2425_v10  ;;  %v1270_v17 = vmul.f32 %v2421_v35, %v2423_v9  ;;  %v1183_v18 = vmul.f32 0.00390625, %v1170_v55  ;;  %v1179_v19 = vmul.f32 0.00390625, %v1158_v13  ;;  %v1252_v55 = vld [vmem:[#allocation3 + $0x38] sm:$0xff] }
 0x454   : > { %v1202_v20 = vmul.f32 %v1186_v11, %v1186_v11  ;;  %v1203_v22 = vmul.f32 %v1187_v41, %v1187_v41  ;;  %v1210_v24 = vmul.f32 %v1194_v14, %v1194_v14  ;;  %v1211_v57 = vmul.f32 %v1195_v15, %v1195_v15 }
 0x455   : > { %v1274_v25 = vadd.f32 %v1266_v16, %v1245_v5  ;;  %v1278_v30 = vadd.f32 %v1270_v17, %v1249_v32  ;;  %v2432_v31 = vsub.f32 %v1183_v18, %v1250_v12  ;;  %v2434_v36 = vsub.f32 %v1179_v19, %v1246_v58 }
 0x456   : > { %v1173_v38 = vpop.xlane.xlu1 %1172  ;;  %v1161_v53 = vpop.xlane.xlu0 %1160  ;;  %v1218_v40 = vadd.f32 %v1203_v22, %v1202_v20  ;;  %v1230_v26 = vadd.f32 %v1211_v57, %v1210_v24  ;;  %v1188_v42 = vsub.f32 %v2358_v23, %v1179_v19  ;;  %v1189_v28 = vsub.f32 %v2364_v51, %v1179_v19 }
 0x457   : > { %1283 = vst.msk [vmem:[#allocation3] sm:$0xff] %vm1282_vm5, %v1274_v25  ;;  %1287 = vst.msk [vmem:[#allocation3 + $0x20] sm:$0xff] %vm1282_vm5, %v1278_v30  ;;  %v1271_v43 = vmul.f32 %v2421_v35, %v2432_v31  ;;  %v1267_v21 = vmul.f32 %v2421_v35, %v2434_v36  ;;  %v1184_v44 = vmul.f32 0.00390625, %v1173_v38  ;;  %v1180_v45 = vmul.f32 0.00390625, %v1161_v53 }
 0x458   : > { %1219 = vadd.xlane.f32.xlu1 %v1218_v40  ;;  %v1204_v33 = vmul.f32 %v1188_v42, %v1188_v42  ;;  %v1205_v46 = vmul.f32 %v1189_v28, %v1189_v28  ;;  %v1196_v47 = vsub.f32 %v2356_v50, %v1183_v18  ;;  %v1197_v48 = vsub.f32 %v2366_v52, %v1183_v18 }
 0x459   : > { %v1279_v49 = vadd.f32 %v1271_v43, %v1250_v12  ;;  %v1275_v23 = vadd.f32 %v1267_v21, %v1246_v58  ;;  %v1259_v51 = vsub.f32 %v1184_v44, %v1251_v37  ;;  %v1255_v54 = vsub.f32 %v1180_v45, %v1247_v39 }
 0x45a   : > { %v1164_v62 = vpop.xlane.xlu0 %1163  ;;  %v1221_v29 = vadd.f32 %v1205_v46, %v1204_v33  ;;  %v1190_v3 = vsub.f32 %v2378_v60, %v1180_v45  ;;  %v1191_v4 = vsub.f32 %v2384_v61, %v1180_v45  ;;  %v1212_v32 = vmul.f32 %v1196_v47, %v1196_v47  ;;  %v1291_v47 = vld [vmem:[#allocation4] sm:$0xff] }
 0x45b   : > { %1288 = vst.msk [vmem:[#allocation3 + $0x28] sm:$0xff] %vm1282_vm5, %v1279_v49  ;;  %1284 = vst.msk [vmem:[#allocation3 + $0x8] sm:$0xff] %vm1282_vm5, %v1275_v23  ;;  %v1272_v50 = vmul.f32 %v2421_v35, %v1259_v51  ;;  %v1268_v52 = vmul.f32 %v2421_v35, %v1255_v54  ;;  %v1181_v34 = vmul.f32 0.00390625, %v1164_v62  ;;  %v1213_v5 = vmul.f32 %v1197_v48, %v1197_v48  ;;  %v1295_v23 = vld [vmem:[#allocation4 + $0x20] sm:$0xff] }
 0x45c   : > { %1231 = vadd.xlane.f32.xlu1 %v1230_v26  ;;  %1222 = vadd.xlane.f32.xlu0 %v1221_v29  ;;  %v1206_v7 = vmul.f32 %v1190_v3, %v1190_v3  ;;  %v1207_v8 = vmul.f32 %v1191_v4, %v1191_v4  ;;  %v1198_v60 = vsub.f32 %v2376_v59, %v1184_v44  ;;  %v1293_v3 = vld [vmem:[#allocation4 + $0x10] sm:$0xff]  ;;  %v1296_v4 = vld [vmem:[#allocation4 + $0x28] sm:$0xff] }
 0x45d   : > { %v1280_v11 = vadd.f32 %v1272_v50, %v1251_v37  ;;  %v1276_v61 = vadd.f32 %v1268_v52, %v1247_v39  ;;  %v1256_v41 = vsub.f32 %v1181_v34, %v1248_v56  ;;  %v1233_v12 = vadd.f32 %v1213_v5, %v1212_v32 }
 0x45e   : > { %v1176_v58 = vpop.xlane.xlu0 %1175  ;;  %v1224_v13 = vadd.f32 %v1207_v8, %v1206_v7  ;;  %v1199_v14 = vsub.f32 %v2386_v27, %v1184_v44  ;;  %v1214_v15 = vmul.f32 %v1198_v60, %v1198_v60  ;;  %v1192_v16 = vsub.f32 %v2396_v63, %v1181_v34  ;;  %v1297_v7 = vld [vmem:[#allocation4 + $0x30] sm:$0xff] }
 0x45f   : > { %1289 = vst.msk [vmem:[#allocation3 + $0x30] sm:$0xff] %vm1282_vm5, %v1280_v11  ;;  %1285 = vst.msk [vmem:[#allocation3 + $0x10] sm:$0xff] %vm1282_vm5, %v1276_v61  ;;  %v1269_v17 = vmul.f32 %v2421_v35, %v1256_v41  ;;  %v1185_v18 = vmul.f32 0.00390625, %v1176_v58  ;;  %v1193_v59 = vsub.f32 %v2402_v1, %v1181_v34  ;;  %v1307_v19 = vmul.f32 %v2425_v10, %v2425_v10  ;;  %v1294_v11 = vld [vmem:[#allocation4 + $0x18] sm:$0xff] }
 0x460   : > { %1225 = vadd.xlane.f32.xlu1 %v1224_v13  ;;  %1234 = vadd.xlane.f32.xlu0 %v1233_v12  ;;  %v1215_v20 = vmul.f32 %v1199_v14, %v1199_v14  ;;  %v1208_v22 = vmul.f32 %v1192_v16, %v1192_v16  ;;  %v1311_v27 = vmul.f32 %v2423_v9, %v2423_v9  ;;  %v1298_v13 = vld [vmem:[#allocation4 + $0x38] sm:$0xff] }
 0x461   : > { %v1277_v63 = vadd.f32 %v1269_v17, %v1248_v56  ;;  %v1260_v24 = vsub.f32 %v1185_v18, %v1252_v55  ;;  %v1209_v57 = vmul.f32 %v1193_v59, %v1193_v59  ;;  %v1200_v25 = vsub.f32 %v2398_v0, %v1185_v18 }
 0x462   : > { %v1236_v30 = vadd.f32 %v1215_v20, %v1214_v15  ;;  %v1201_v37 = vsub.f32 %v2406_v2, %v1185_v18  ;;  %v1317_v38 = vmul.f32 %v1316_v6, %v1307_v19  ;;  %v1321_v1 = vmul.f32 %v1316_v6, %v1311_v27 }
 0x463   : > { %1286 = vst.msk [vmem:[#allocation3 + $0x18] sm:$0xff] %vm1282_vm5, %v1277_v63  ;;  %v1273_v10 = vmul.f32 %v2421_v35, %v1260_v24  ;;  %v1227_v39 = vadd.f32 %v1209_v57, %v1208_v22  ;;  %v1216_v53 = vmul.f32 %v1200_v25, %v1200_v25  ;;  %v1308_v40 = vmul.f32 %v2434_v36, %v2434_v36 }
 0x464   : > { %1237 = vadd.xlane.f32.xlu1 %v1236_v30  ;;  %v1217_v9 = vmul.f32 %v1201_v37, %v1201_v37  ;;  %v1309_v26 = vmul.f32 %v1255_v54, %v1255_v54  ;;  %v1312_v0 = vmul.f32 %v2432_v31, %v2432_v31  ;;  %v1313_v42 = vmul.f32 %v1259_v51, %v1259_v51  ;;  %v1292_v31 = vld [vmem:[#allocation4 + $0x8] sm:$0xff] }
 0x465   : > { %v1281_v28 = vadd.f32 %v1273_v10, %v1252_v55  ;;  %1228 = vadd.xlane.f32.xlu0 %v1227_v39  ;;  %v1318_v2 = vmul.f32 %v1316_v6, %v1308_v40  ;;  %v1310_v43 = vmul.f32 %v1256_v41, %v1256_v41  ;;  %v1314_v21 = vmul.f32 %v1260_v24, %v1260_v24 }
 0x466   : > { %v1239_v44 = vadd.f32 %v1217_v9, %v1216_v53  ;;  %v1319_v45 = vmul.f32 %v1316_v6, %v1309_v26  ;;  %v1322_v35 = vmul.f32 %v1316_v6, %v1312_v0  ;;  %v1323_v33 = vmul.f32 %v1316_v6, %v1313_v42 }
 0x467   : > { %1290 = vst.msk [vmem:[#allocation3 + $0x38] sm:$0xff] %vm1282_vm5, %v1281_v28  ;;  %v1320_v46 = vmul.f32 %v1316_v6, %v1310_v43  ;;  %v1324_v36 = vmul.f32 %v1316_v6, %v1314_v21 }
 0x469   : > { %1240 = vadd.xlane.f32.xlu0 %v1239_v44 }
 0x4e5   : > { %v1220_v48 = vpop.xlane.xlu1 %1219 }
 0x4e6   : > { %v1299_v49 = vadd.f32 %v1291_v47, %v1220_v48 }
 0x4e8   : > { %v1325_v51 = vadd.f32 %v1317_v38, %v1299_v49 }
 0x4e9   : > { %v1232_v54 = vpop.xlane.xlu1 %1231  ;;  %v1223_v56 = vpop.xlane.xlu0 %1222 }
 0x4ea   : > { %1333 = vst.msk [vmem:[#allocation4] sm:$0xff] %vm1282_vm5, %v1325_v51  ;;  %v1303_v62 = vadd.f32 %v1295_v23, %v1232_v54  ;;  %v1300_v29 = vadd.f32 %v1292_v31, %v1223_v56 }
 0x4ec   : > { %v1329_v32 = vadd.f32 %v1321_v1, %v1303_v62  ;;  %v1326_v50 = vadd.f32 %v1318_v2, %v1300_v29 }
 0x4ed   : > { %v1226_v52 = vpop.xlane.xlu1 %1225  ;;  %v1235_v34 = vpop.xlane.xlu0 %1234 }
 0x4ee   : > { %1337 = vst.msk [vmem:[#allocation4 + $0x20] sm:$0xff] %vm1282_vm5, %v1329_v32  ;;  %1334 = vst.msk [vmem:[#allocation4 + $0x8] sm:$0xff] %vm1282_vm5, %v1326_v50  ;;  %v1301_v5 = vadd.f32 %v1293_v3, %v1226_v52  ;;  %v1304_v6 = vadd.f32 %v1296_v4, %v1235_v34 }
 0x4f0   : > { %v1327_v8 = vadd.f32 %v1319_v45, %v1301_v5  ;;  %v1330_v60 = vadd.f32 %v1322_v35, %v1304_v6 }
 0x4f1   : > { %v1238_v61 = vpop.xlane.xlu1 %1237 }
 0x4f2   : > { %1335 = vst.msk [vmem:[#allocation4 + $0x10] sm:$0xff] %vm1282_vm5, %v1327_v8  ;;  %1338 = vst.msk [vmem:[#allocation4 + $0x28] sm:$0xff] %vm1282_vm5, %v1330_v60  ;;  %v1305_v41 = vadd.f32 %v1297_v7, %v1238_v61  ;;  %v1229_v12 = vpop.xlane.xlu0 %1228 }
 0x4f3   : > { %v1302_v55 = vadd.f32 %v1294_v11, %v1229_v12 }
 0x4f4   : > { %v1331_v58 = vadd.f32 %v1323_v33, %v1305_v41 }
 0x4f5   : > { %v1328_v14 = vadd.f32 %v1320_v46, %v1302_v55 }
 0x4f6   : > { %1339 = vst.msk [vmem:[#allocation4 + $0x30] sm:$0xff] %vm1282_vm5, %v1331_v58  ;;  %v1241_v15 = vpop.xlane.xlu0 %1240 }
 0x4f7   : > { %1336 = vst.msk [vmem:[#allocation4 + $0x18] sm:$0xff] %vm1282_vm5, %v1328_v14  ;;  %v1306_v16 = vadd.f32 %v1298_v13, %v1241_v15 }
 0x4f9   : > { %v1332_v17 = vadd.f32 %v1324_v36, %v1306_v16 }
 0x4fb   : > { %1340 = vst.msk [vmem:[#allocation4 + $0x38] sm:$0xff] %vm1282_vm5, %v1332_v17 }
 0x4fc PF: > { %p1341_p5 = pnand %p823_p3, %p435_p13 }
 0x4fd   : > { %v1345_v18 = vld [vmem:[#allocation4] sm:$0xff] (!%p1341_p5)  ;;  %v1346_v59 = vld [vmem:[#allocation4 + $0x8] sm:$0xff] (!%p1341_p5)  ;;  %v1347_v22 = vld [vmem:[#allocation4 + $0x10] sm:$0xff] (!%p1341_p5)  ;;  %vm1393_vm6 = vcmask (!%p1341_p5), 7168  }
 0x4fe   : > { %1344 = sbr.rel (%p1341_p5) target bundleno = 1307 (0x51b), region = 56  ;;  %v1353_v19 = vmul.f32 (!%p1341_p5), 0.001953125, %v1345_v18  ;;  %v1354_v20 = vmul.f32 (!%p1341_p5), 0.001953125, %v1346_v59  ;;  %v1355_v27 = vmul.f32 (!%p1341_p5), 0.001953125, %v1347_v22  ;;  %v1348_v63 = vld [vmem:[#allocation4 + $0x18] sm:$0xff] (!%p1341_p5)  ;;  %v1349_v24 = vld [vmem:[#allocation4 + $0x20] sm:$0xff] (!%p1341_p5) }
 0x4ff   : > { %v1356_v30 = vmul.f32 (!%p1341_p5), 0.001953125, %v1348_v63  ;;  %v1357_v37 = vmul.f32 (!%p1341_p5), 0.001953125, %v1349_v24  ;;  %v1350_v1 = vld [vmem:[#allocation4 + $0x28] sm:$0xff] (!%p1341_p5)  ;;  %v1351_v40 = vld [vmem:[#allocation4 + $0x30] sm:$0xff] (!%p1341_p5)  ;;  %v1377_v43 = vld [vmem:[%s2090_s15] sm:$0xff] (!%p1341_p5) }
 0x500   : > { %v1361_v57 = vadd.f32 (!%p1341_p5), 1e-05, %v1353_v19  ;;  %v1362_v25 = vadd.f32 (!%p1341_p5), 1e-05, %v1354_v20  ;;  %v1363_v38 = vadd.f32 (!%p1341_p5), 1e-05, %v1355_v27 }
 0x501   : > { %v1364_v10 = vadd.f32 (!%p1341_p5), 1e-05, %v1356_v30  ;;  %v1365_v39 = vadd.f32 (!%p1341_p5), 1e-05, %v1357_v37  ;;  %v1358_v53 = vmul.f32 (!%p1341_p5), 0.001953125, %v1350_v1  ;;  %v1359_v9 = vmul.f32 (!%p1341_p5), 0.001953125, %v1351_v40 }
 0x502   : > { %1941 = vrsqrt.f32 (!%p1341_p5), %v1361_v57  ;;  %v1352_v26 = vld [vmem:[#allocation4 + $0x38] sm:$0xff] (!%p1341_p5)  ;;  %v1378_v21 = vld [vmem:[%s2090_s15 + $0x8] sm:$0xff] (!%p1341_p5)  ;;  %v1379_v45 = vld [vmem:[%s2090_s15 + $0x10] sm:$0xff] (!%p1341_p5) }
 0x503   : > { %1943 = vrsqrt.f32 (!%p1341_p5), %v1362_v25  ;;  %v1366_v0 = vadd.f32 (!%p1341_p5), 1e-05, %v1358_v53  ;;  %v1360_v42 = vmul.f32 (!%p1341_p5), 0.001953125, %v1352_v26  ;;  %v1367_v28 = vadd.f32 (!%p1341_p5), 1e-05, %v1359_v9  ;;  %v1410_v35 = vld [vmem:[#allocation3] sm:$0xff] (!%p1341_p5) }
 0x504   : > { %1945 = vrsqrt.f32 (!%p1341_p5), %v1363_v38  ;;  %v1380_v36 = vld [vmem:[%s2090_s15 + $0x18] sm:$0xff] (!%p1341_p5)  ;;  %v1411_v47 = vld [vmem:[#allocation3 + $0x8] sm:$0xff] (!%p1341_p5)  ;;  %v1381_v23 = vld [vmem:[%s2090_s15 + $0x20] sm:$0xff] (!%p1341_p5) }
 0x505   : > { %1947 = vrsqrt.f32 %v1364_v10  ;;  %v1368_v2 = vadd.f32 1e-05, %v1360_v42  ;;  %v1402_v31 = vld [vmem:[%s2095_s26] sm:$0xff]  ;;  %v1412_v51 = vld [vmem:[#allocation3 + $0x10] sm:$0xff]  ;;  %v1382_v62 = vld [vmem:[%s2090_s15 + $0x28] sm:$0xff] }
 0x506   : > { %1949 = vrsqrt.f32 %v1365_v39  ;;  %v1403_v3 = vld [vmem:[%s2095_s26 + $0x8] sm:$0xff]  ;;  %v1413_v4 = vld [vmem:[#allocation3 + $0x18] sm:$0xff]  ;;  %v1383_v52 = vld [vmem:[%s2090_s15 + $0x30] sm:$0xff] }
 0x507   : > { %1951 = vrsqrt.f32 %v1366_v0  ;;  %v1404_v5 = vld [vmem:[%s2095_s26 + $0x10] sm:$0xff]  ;;  %v1414_v6 = vld [vmem:[#allocation3 + $0x20] sm:$0xff]  ;;  %v1384_v60 = vld [vmem:[%s2090_s15 + $0x38] sm:$0xff] }
 0x508   : > { %1953 = vrsqrt.f32 %v1367_v28  ;;  %v1405_v41 = vld [vmem:[%s2095_s26 + $0x18] sm:$0xff]  ;;  %v1415_v12 = vld [vmem:[#allocation3 + $0x28] sm:$0xff]  ;;  %v1406_v15 = vld [vmem:[%s2095_s26 + $0x20] sm:$0xff] }
 0x509   : > { %1955 = vrsqrt.f32 %v1368_v2  ;;  %v1416_v16 = vld [vmem:[#allocation3 + $0x30] sm:$0xff]  ;;  %v1407_v20 = vld [vmem:[%s2095_s26 + $0x28] sm:$0xff]  ;;  %v1417_v22 = vld [vmem:[#allocation3 + $0x38] sm:$0xff] }
 0x50a   : > { %v1408_v57 = vld [vmem:[%s2095_s26 + $0x30] sm:$0xff]  ;;  %v1409_v37 = vld [vmem:[%s2095_s26 + $0x38] sm:$0xff] }
 0x50c   : > { %v1942_v44 = vpop.eup %1941 }
 0x50d   : > { %v1944_v33 = vpop.eup %1943  ;;  %v1385_v46 = vmul.f32 %v1942_v44, %v1377_v43 }
 0x50e   : > { %v1946_v48 = vpop.eup %1945  ;;  %v1386_v49 = vmul.f32 %v1944_v33, %v1378_v21 }
 0x50f   : > { %v1948_v54 = vpop.eup %1947  ;;  %1394 = vst.msk [vmem:[#allocation5] sm:$0xff] %vm1393_vm6, %v1385_v46  ;;  %v1387_v56 = vmul.f32 %v1946_v48, %v1379_v45  ;;  %v1418_v29 = vmul.f32 %v1410_v35, %v1385_v46 }
 0x510   : > { %v1950_v32 = vpop.eup %1949  ;;  %1395 = vst.msk [vmem:[#allocation5 + $0x8] sm:$0xff] %vm1393_vm6, %v1386_v49  ;;  %v1388_v50 = vmul.f32 %v1948_v54, %v1380_v36  ;;  %v1419_v34 = vmul.f32 %v1411_v47, %v1386_v49 }
 0x511   : > { %v1952_v7 = vpop.eup %1951  ;;  %1396 = vst.msk [vmem:[#allocation5 + $0x10] sm:$0xff] %vm1393_vm6, %v1387_v56  ;;  %v1389_v8 = vmul.f32 %v1950_v32, %v1381_v23  ;;  %v1426_v11 = vsub.f32 %v1402_v31, %v1418_v29  ;;  %v1420_v61 = vmul.f32 %v1412_v51, %v1387_v56 }
 0x512   : > { %v1954_v55 = vpop.eup %1953  ;;  %1397 = vst.msk [vmem:[#allocation5 + $0x18] sm:$0xff] %vm1393_vm6, %v1388_v50  ;;  %v1390_v58 = vmul.f32 %v1952_v7, %v1382_v62  ;;  %v1427_v13 = vsub.f32 %v1403_v3, %v1419_v34  ;;  %v1421_v14 = vmul.f32 %v1413_v4, %v1388_v50 }
 0x513   : > { %v1956_v17 = vpop.eup %1955  ;;  %1398 = vst.msk [vmem:[#allocation5 + $0x20] sm:$0xff] %vm1393_vm6, %v1389_v8  ;;  %v1391_v18 = vmul.f32 %v1954_v55, %v1383_v52  ;;  %1434 = vst.msk [vmem:[#allocation6] sm:$0xff] %vm1393_vm6, %v1426_v11  ;;  %v1428_v59 = vsub.f32 %v1404_v5, %v1420_v61  ;;  %v1422_v19 = vmul.f32 %v1414_v6, %v1389_v8 }
 0x514   : > { %1399 = vst.msk [vmem:[#allocation5 + $0x28] sm:$0xff] %vm1393_vm6, %v1390_v58  ;;  %v1392_v27 = vmul.f32 %v1956_v17, %v1384_v60  ;;  %1435 = vst.msk [vmem:[#allocation6 + $0x8] sm:$0xff] %vm1393_vm6, %v1427_v13  ;;  %v1429_v63 = vsub.f32 %v1405_v41, %v1421_v14  ;;  %v1423_v24 = vmul.f32 %v1415_v12, %v1390_v58 }
 0x515   : > { %1400 = vst.msk [vmem:[#allocation5 + $0x30] sm:$0xff] %vm1393_vm6, %v1391_v18  ;;  %1436 = vst.msk [vmem:[#allocation6 + $0x10] sm:$0xff] %vm1393_vm6, %v1428_v59  ;;  %v1430_v25 = vsub.f32 %v1406_v15, %v1422_v19  ;;  %v1424_v30 = vmul.f32 %v1416_v16, %v1391_v18 }
 0x516   : > { %1401 = vst.msk [vmem:[#allocation5 + $0x38] sm:$0xff] %vm1393_vm6, %v1392_v27  ;;  %1437 = vst.msk [vmem:[#allocation6 + $0x18] sm:$0xff] %vm1393_vm6, %v1429_v63  ;;  %v1431_v38 = vsub.f32 %v1407_v20, %v1423_v24  ;;  %v1425_v1 = vmul.f32 %v1417_v22, %v1392_v27 }
 0x517   : > { %1438 = vst.msk [vmem:[#allocation6 + $0x20] sm:$0xff] %vm1393_vm6, %v1430_v25  ;;  %v1432_v10 = vsub.f32 %v1408_v57, %v1424_v30 }
 0x518   : > { %1439 = vst.msk [vmem:[#allocation6 + $0x28] sm:$0xff] %vm1393_vm6, %v1431_v38  ;;  %v1433_v39 = vsub.f32 %v1409_v37, %v1425_v1 }
 0x519   : > { %1440 = vst.msk [vmem:[#allocation6 + $0x30] sm:$0xff] %vm1393_vm6, %v1432_v10 }
 0x51a   : > { %1441 = vst.msk [vmem:[#allocation6 + $0x38] sm:$0xff] %vm1393_vm6, %v1433_v39 }
 0x51b PF: > { %p1838_p6 = scmp.ne.s32.totalorder %s1985_s19, 4 }
 0x51c   : > { %v1467_v53 = vld [vmem:[#allocation5 + $0x10] sm:$0xff] (!%p1838_p6)  ;;  %v1465_v40 = vld [vmem:[#allocation5] sm:$0xff] (!%p1838_p6)  ;;  %v2003_v9 = vmov (!%p1838_p6), 0   ;;  %v1468_v26 = vld [vmem:[#allocation5 + $0x18] sm:$0xff] (!%p1838_p6)  ;;  %s1858_s19 = sshll.u32 (!%p1838_p6), %s1981_s18, 7 }
 0x51d   : > { %1445 = sbr.rel (%p1838_p6) target bundleno = 1472 (0x5c0), region = 60  ;;  %1958 = vset.pattern.permute.xlu1 (!%p1838_p6), %v2003_v9  ;;  %1957 = vset.pattern.permute.xlu0 (!%p1838_p6), %v2003_v9  ;;  %v1466_v0 = vld [vmem:[#allocation5 + $0x8] sm:$0xff] (!%p1838_p6)  ;;  %v1469_v28 = vld [vmem:[#allocation5 + $0x20] sm:$0xff] (!%p1838_p6)  ;;  %v1472_v2 = vld [vmem:[#allocation5 + $0x38] sm:$0xff] (!%p1838_p6)  ;;  %s2521_s15 = scalar_lea.vmem (!%p1838_p6), [#allocation2], %s1858_s19 }
 0x51e   : > { %1485 = vperm.xlu1 (!%p1838_p6), %1958, %v1467_v53   ;;  %1475 = vperm.xlu0 (!%p1838_p6), %1957, %v1465_v40   ;;  %v1470_v42 = vld [vmem:[#allocation5 + $0x28] sm:$0xff] (!%p1838_p6)  ;;  %v1471_v43 = vld [vmem:[#allocation5 + $0x30] sm:$0xff] (!%p1838_p6)  ;;  %v1529_v44 = vld [vmem:[#allocation6] sm:$0xff] (!%p1838_p6) }
 0x51f   : > { %v1530_v21 = vld [vmem:[#allocation6 + $0x8] sm:$0xff] (!%p1838_p6)  ;;  %v1532_v45 = vld [vmem:[#allocation6 + $0x18] sm:$0xff] (!%p1838_p6)  ;;  %v1531_v35 = vld [vmem:[#allocation6 + $0x10] sm:$0xff] (!%p1838_p6) }
 0x520   : > { %v1534_v33 = vld [vmem:[#allocation6 + $0x28] sm:$0xff] (!%p1838_p6)  ;;  %v1533_v46 = vld [vmem:[#allocation6 + $0x20] sm:$0xff] (!%p1838_p6)  ;;  %v1535_v47 = vld [vmem:[#allocation6 + $0x30] sm:$0xff] (!%p1838_p6) }
 0x521   : > { %v1536_v36 = vld [vmem:[#allocation6 + $0x38] sm:$0xff] (!%p1838_p6)  ;;  %v1449_v56 = vld [vmem:[%s2521_s15] sm:$0xff] (!%p1838_p6)  ;;  %v1450_v62 = vld [vmem:[%s2521_s15 + $0x8] sm:$0xff] (!%p1838_p6) }
 0x522   : > { %1490 = vperm.xlu1 (!%p1838_p6), %1958, %v1468_v26   ;;  %1480 = vperm.xlu0 (!%p1838_p6), %1957, %v1466_v0   ;;  %v1451_v29 = vld [vmem:[%s2521_s15 + $0x10] sm:$0xff] (!%p1838_p6)  ;;  %v1452_v3 = vld [vmem:[%s2521_s15 + $0x18] sm:$0xff] (!%p1838_p6)  ;;  %v1453_v50 = vld [vmem:[%s2521_s15 + $0x20] sm:$0xff] (!%p1838_p6) }
 0x523   : > { %v1454_v52 = vld [vmem:[%s2521_s15 + $0x28] sm:$0xff] (!%p1838_p6)  ;;  %v1455_v6 = vld [vmem:[%s2521_s15 + $0x30] sm:$0xff] (!%p1838_p6)  ;;  %v1456_v7 = vld [vmem:[%s2521_s15 + $0x38] sm:$0xff] (!%p1838_p6) }
 0x524   : > { %v1459_v17 = vld [vmem:[%s2521_s15 + $0x50] sm:$0xff]  ;;  %v1460_v18 = vld [vmem:[%s2521_s15 + $0x58] sm:$0xff]  ;;  %v1457_v59 = vld [vmem:[%s2521_s15 + $0x40] sm:$0xff] }
 0x525   : > { %v1458_v19 = vld [vmem:[%s2521_s15 + $0x48] sm:$0xff]  ;;  %v1463_v40 = vld [vmem:[%s2521_s15 + $0x70] sm:$0xff]  ;;  %v1464_v9 = vld [vmem:[%s2521_s15 + $0x78] sm:$0xff] }
 0x526   : > { %1500 = vperm.xlu1 %1958, %v1470_v42   ;;  %1495 = vperm.xlu0 %1957, %v1469_v28   ;;  %v1461_v26 = vld [vmem:[%s2521_s15 + $0x60] sm:$0xff]  ;;  %v1462_v0 = vld [vmem:[%s2521_s15 + $0x68] sm:$0xff] }
 0x52a   : > { %1510 = vperm.xlu1 %1958, %v1472_v2   ;;  %1505 = vperm.xlu0 %1957, %v1471_v43  }
 0x52e   : > { %1544 = vperm.xlu1 %1958, %v1530_v21   ;;  %1539 = vperm.xlu0 %1957, %v1529_v44  }
 0x532   : > { %1554 = vperm.xlu1 %1958, %v1532_v45   ;;  %1549 = vperm.xlu0 %1957, %v1531_v35  }
 0x536   : > { %1564 = vperm.xlu1 %1958, %v1534_v33   ;;  %1559 = vperm.xlu0 %1957, %v1533_v46  }
 0x53a   : > { %1574 = vperm.xlu1 %1958, %v1536_v36   ;;  %1569 = vperm.xlu0 %1957, %v1535_v47  }
 0x59d   : > { %v1486_v48 = vpop.permute.xlu1 %1485  ;;  %v1476_v49 = vpop.permute.xlu0 %1475 }
 0x59e   : > { %v1513_v34 = vmul.f32 %v1476_v49, %v1449_v56  ;;  %v1514_v5 = vmul.f32 %v1476_v49, %v1450_v62  ;;  %v1517_v13 = vmul.f32 %v1486_v48, %v1453_v50  ;;  %v1518_v14 = vmul.f32 %v1486_v48, %v1454_v52 }
 0x5a1   : > { %v1491_v23 = vpop.permute.xlu1 %1490  ;;  %v1481_v31 = vpop.permute.xlu0 %1480 }
 0x5a2   : > { %v1515_v8 = vmul.f32 %v1481_v31, %v1451_v29  ;;  %v1516_v60 = vmul.f32 %v1481_v31, %v1452_v3  ;;  %v1519_v15 = vmul.f32 %v1491_v23, %v1455_v6  ;;  %v1520_v16 = vmul.f32 %v1491_v23, %v1456_v7 }
 0x5a5   : > { %v1501_v51 = vpop.permute.xlu1 %1500  ;;  %v1496_v54 = vpop.permute.xlu0 %1495 }
 0x5a6   : > { %v1523_v1 = vmul.f32 %v1501_v51, %v1459_v17  ;;  %v1524_v10 = vmul.f32 %v1501_v51, %v1460_v18  ;;  %v1521_v39 = vmul.f32 %v1496_v54, %v1457_v59  ;;  %v1522_v53 = vmul.f32 %v1496_v54, %v1458_v19 }
 0x5a9   : > { %v1511_v4 = vpop.permute.xlu1 %1510  ;;  %v1506_v32 = vpop.permute.xlu0 %1505 }
 0x5aa   : > { %v1527_v36 = vmul.f32 %v1511_v4, %v1463_v40  ;;  %v1528_v47 = vmul.f32 %v1511_v4, %v1464_v9  ;;  %v1525_v48 = vmul.f32 %v1506_v32, %v1461_v26  ;;  %v1526_v49 = vmul.f32 %v1506_v32, %v1462_v0 }
 0x5ad   : > { %v1545_v11 = vpop.permute.xlu1 %1544  ;;  %v1540_v61 = vpop.permute.xlu0 %1539 }
 0x5ae   : > { %v1579_v41 = vadd.f32 %v1545_v11, %v1515_v8  ;;  %v1580_v12 = vadd.f32 %v1545_v11, %v1516_v60  ;;  %v1577_v55 = vadd.f32 %v1540_v61, %v1513_v34  ;;  %v1578_v58 = vadd.f32 %v1540_v61, %v1514_v5 }
 0x5b0   : > { %v1595_v20 = vmax.f32 %v1579_v41, 0.0  ;;  %v1596_v22 = vmax.f32 %v1580_v12, 0.0  ;;  %v1593_v27 = vmax.f32 %v1577_v55, 0.0  ;;  %v1594_v63 = vmax.f32 %v1578_v58, 0.0 }
 0x5b1   : > { %v1555_v24 = vpop.permute.xlu1 %1554  ;;  %v1550_v57 = vpop.permute.xlu0 %1549 }
 0x5b2   : > { %1611 = vst [vmem:[%s2100_s29 + $0x10] sm:$0xff] %v1595_v20  ;;  %1612 = vst [vmem:[%s2100_s29 + $0x18] sm:$0xff] %v1596_v22  ;;  %v1583_v25 = vadd.f32 %v1555_v24, %v1519_v15  ;;  %v1584_v30 = vadd.f32 %v1555_v24, %v1520_v16  ;;  %v1581_v37 = vadd.f32 %v1550_v57, %v1517_v13 }
 0x5b3   : > { %1609 = vst [vmem:[%s2100_s29] sm:$0xff] %v1593_v27  ;;  %1610 = vst [vmem:[%s2100_s29 + $0x8] sm:$0xff] %v1594_v63  ;;  %v1582_v38 = vadd.f32 %v1550_v57, %v1518_v14 }
 0x5b4   : > { %v1599_v42 = vmax.f32 %v1583_v25, 0.0  ;;  %v1600_v28 = vmax.f32 %v1584_v30, 0.0  ;;  %v1597_v2 = vmax.f32 %v1581_v37, 0.0 }
 0x5b5   : > { %v1598_v43 = vmax.f32 %v1582_v38, 0.0  ;;  %v1565_v21 = vpop.permute.xlu1 %1564  ;;  %v1560_v44 = vpop.permute.xlu0 %1559 }
 0x5b6   : > { %1615 = vst [vmem:[%s2100_s29 + $0x30] sm:$0xff] %v1599_v42  ;;  %1616 = vst [vmem:[%s2100_s29 + $0x38] sm:$0xff] %v1600_v28  ;;  %v1587_v45 = vadd.f32 %v1565_v21, %v1523_v1  ;;  %v1588_v35 = vadd.f32 %v1565_v21, %v1524_v10  ;;  %v1585_v33 = vadd.f32 %v1560_v44, %v1521_v39 }
 0x5b7   : > { %1613 = vst [vmem:[%s2100_s29 + $0x20] sm:$0xff] %v1597_v2  ;;  %1614 = vst [vmem:[%s2100_s29 + $0x28] sm:$0xff] %v1598_v43  ;;  %v1586_v46 = vadd.f32 %v1560_v44, %v1522_v53 }
 0x5b8   : > { %v1603_v23 = vmax.f32 %v1587_v45, 0.0  ;;  %v1604_v31 = vmax.f32 %v1588_v35, 0.0  ;;  %v1601_v51 = vmax.f32 %v1585_v33, 0.0 }
 0x5b9   : > { %v1602_v54 = vmax.f32 %v1586_v46, 0.0  ;;  %v1575_v56 = vpop.permute.xlu1 %1574  ;;  %v1570_v62 = vpop.permute.xlu0 %1569 }
 0x5ba   : > { %1619 = vst [vmem:[%s2100_s29 + $0x50] sm:$0xff] %v1603_v23  ;;  %1620 = vst [vmem:[%s2100_s29 + $0x58] sm:$0xff] %v1604_v31  ;;  %v1591_v29 = vadd.f32 %v1575_v56, %v1527_v36  ;;  %v1592_v3 = vadd.f32 %v1575_v56, %v1528_v47  ;;  %v1589_v50 = vadd.f32 %v1570_v62, %v1525_v48 }
 0x5bb   : > { %1617 = vst [vmem:[%s2100_s29 + $0x40] sm:$0xff] %v1601_v51  ;;  %1618 = vst [vmem:[%s2100_s29 + $0x48] sm:$0xff] %v1602_v54  ;;  %v1590_v4 = vadd.f32 %v1570_v62, %v1526_v49 }
 0x5bc   : > { %v1607_v52 = vmax.f32 %v1591_v29, 0.0  ;;  %v1608_v32 = vmax.f32 %v1592_v3, 0.0  ;;  %v1605_v34 = vmax.f32 %v1589_v50, 0.0 }
 0x5bd   : > { %v1606_v5 = vmax.f32 %v1590_v4, 0.0 }
 0x5be   : > { %1623 = vst [vmem:[%s2100_s29 + $0x70] sm:$0xff] %v1607_v52  ;;  %1624 = vst [vmem:[%s2100_s29 + $0x78] sm:$0xff] %v1608_v32 }
 0x5bf   : > { %1621 = vst [vmem:[%s2100_s29 + $0x60] sm:$0xff] %v1605_v34  ;;  %1622 = vst [vmem:[%s2100_s29 + $0x68] sm:$0xff] %v1606_v5 }
 0x5c0 PF: > { %s15_s22 = sadd.s32 1, %s1997_s22   ;;  %s2576_s18 = smov %s1989_s20 }
 0x5c1   : > { %p12_p7 = scmp.ge.s32.totalorder %s15_s22, 12   ;;  %s2577_s19 = smov %s1993_s21 }
 0x5c2   : > { %s2578_s20 = smov %s2581_s23  ;;  %s2579_s21 = smov %s2585_s24 }
 0x5c3   :  { %14 = sbr.rel (!%p12_p7) target bundleno = 3 (0x3), region = 102 }

</bundles_post_ra>
